<compile_context>
chip_gen: v7x
topology: tpu7x:2x2x1
jax: 0.10.0
libtpu: 0.0.40
codegen_flags: <defaults>
</compile_context>

<pallas_src>
import functools

import numpy as np

import jax
import jax.numpy as jnp
from jax import lax
from jax.experimental import pallas as pl
from jax.experimental.pallas import tpu as pltpu


# ------------------ one-time parameter re-layout (outside the hot path) ------------------

def _unfold_matrix(Win):
    """U[dx, p, j] = 1 where padded input column p feeds conv output column w_out(j) for
    kernel tap dx.  Columns j are ordered [all even w_out | all odd w_out] so the kernel
    2x2-max-pools along w by taking the max of the two column halves."""
    Wh = Win // 2
    U = np.zeros((3, Win + 2, Win), np.float32)
    for dx in range(3):
        for j in range(Win):
            w_out = 2 * j if j < Wh else 2 * (j - Wh) + 1
            U[dx, w_out + dx, j] = 1.0
    return U


def _conv_slab_weights(w_oihw, Win):
    """(Cout, Cin, 3, 3) -> (3*(Win+2)*Cin, Win*Cout) tap-fused block-Toeplitz weights.

    Row index  = dy*(Win+2)*Cin + p*Cin + c   (dy kernel row, p padded col, c in-channel)
    Col index  = j*Cout + o                   (j ordered [even w | odd w], o out-channel)
    """
    Cout, Cin, _, _ = w_oihw.shape
    U = jnp.asarray(_unfold_matrix(Win))                       # (3, Win+2, Win)
    slab = jnp.einsum('xpj,ocyx->ypcjo', U, w_oihw)            # (3, Win+2, Cin, Win, Cout)
    return slab.reshape(3 * (Win + 2) * Cin, Win * Cout)


def prepare_c1_params(params, H, W, lanes_out=128):
    """One-time re-layout of C1 parameters into Pallas-friendly slabs (call once)."""
    C1 = params["w1"].shape[0]
    C2 = params["w2"].shape[0]
    W2 = W // 2
    Hl, Wl = H // 4, W // 4
    K = params["bl"].shape[0]
    assert K <= lanes_out

    w1 = _conv_slab_weights(params["w1"], W).astype(jnp.bfloat16)    # (3*(W+2)*Cin,  W*C1)
    w2 = _conv_slab_weights(params["w2"], W2).astype(jnp.bfloat16)   # (3*(W2+2)*C1, W2*C2)
    b1 = jnp.tile(params["b1"], W // 2).reshape(1, (W // 2) * C1).astype(jnp.float32)
    b2 = jnp.tile(params["b2"], W2 // 2).reshape(1, (W2 // 2) * C2).astype(jnp.float32)

    # Head: PyTorch NCHW-flatten rows -> per-h (w, c) slab rows, logits padded to 128 lanes.
    wl = (params["wl"].reshape(C2, Hl, Wl, K).transpose(1, 2, 0, 3)
          .reshape(Hl, Wl * C2, K))
    wl = jnp.concatenate([wl, jnp.zeros((Hl, Wl * C2, lanes_out - K), wl.dtype)], axis=-1)
    bl = jnp.concatenate([params["bl"], jnp.zeros((lanes_out - K,), jnp.float32)])
    return {"w1": w1, "b1": b1, "w2": w2, "b2": b2,
            "wl": wl.astype(jnp.bfloat16), "bl": bl.reshape(1, lanes_out)}


# ------------------------------------ fused kernel ----------------------------------------

def _conv_relu_pool(x, w_ref, b_ref, B, Hin, Win, Cin, Cout):
    """Conv3x3(pad=1) + bias + ReLU + MaxPool2x2 on a (B, Hin, Win*Cin) activation value.

    One matmul: (B*Hin, 3*(Win+2)*Cin) x (3*(Win+2)*Cin, Win*Cout); pooling is a lane-half
    max (w) and an adjacent-row max (h); ReLU/bias applied after pooling (they commute).
    Returns (B, Hin//2, (Win//2)*Cout) float32.
    """
    L = (Win + 2) * Cin
    zc = jnp.zeros((B, Hin, Cin), x.dtype)
    xw = jnp.concatenate([zc, x, zc], axis=2)                        # zero-pad width
    zr = jnp.zeros((B, 1, L), x.dtype)
    xp = jnp.concatenate([zr, xw, zr], axis=1)                       # zero-pad height
    # Tap-fused im2col along h: lane index = dy*L + p*Cin + c.
    lhs = jnp.concatenate([xp[:, dy:dy + Hin, :] for dy in range(3)], axis=2)
    lhs = lhs.reshape(B * Hin, 3 * L).astype(jnp.bfloat16)
    res = jnp.dot(lhs, w_ref[...], preferred_element_type=jnp.float32)   # (B*Hin, Win*Cout)

    wc = (Win // 2) * Cout
    wpool = jnp.maximum(res[:, :wc], res[:, wc:])                    # pool over w
    r3 = wpool.reshape(B * Hin // 2, 2, wc)
    hpool = jnp.maximum(r3[:, 0, :], r3[:, 1, :])                    # pool over h
    hpool = hpool.reshape(B, Hin // 2, wc)
    return jnp.maximum(hpool + b_ref[...].reshape(1, 1, wc), 0.0)    # bias + ReLU


def _c1_kernel(x_ref, w1_ref, b1_ref, w2_ref, b2_ref, wl_ref, bl_ref, out_ref,
               *, H, W, Cin, C1, C2):
    B = x_ref.shape[0]
    x = x_ref[...]                                                    # (B, H, W*Cin) f32

    # encoder
    p1 = _conv_relu_pool(x, w1_ref, b1_ref, B, H, W, Cin, C1)         # (B, H/2, (W/2)*C1)
    p2 = _conv_relu_pool(p1, w2_ref, b2_ref, B, H // 2, W // 2, C1, C2)  # (B, H/4, (W/4)*C2)

    # chead: flatten(h, w, c) + Linear, as Hl accumulated matmuls (no row->lane shuffle).
    Hl = H // 4
    acc = jnp.dot(p2[:, 0, :].astype(jnp.bfloat16), wl_ref[0],
                  preferred_element_type=jnp.float32)
    for h in range(1, Hl):
        acc = acc + jnp.dot(p2[:, h, :].astype(jnp.bfloat16), wl_ref[h],
                            preferred_element_type=jnp.float32)
    out_ref[...] = (acc + bl_ref[...]).astype(out_ref.dtype)          # lane-dense (B, 128)


# -------------------------------------- wrapper --------------------------------------------

def c1_forward(prepped, x_nchw, *, num_classes=10, block_n=8):
    """C1.forward: encoder(x) then chead(x).  Input: NCHW float32.  Output: (N, num_classes)."""
    N, Cin, H, W = x_nchw.shape
    assert H % 4 == 0 and W % 4 == 0, "two MaxPool2d(2,2) require H, W divisible by 4"
    C1 = prepped["b1"].shape[1] // (W // 2)
    C2 = prepped["b2"].shape[1] // (W // 4)
    Kp = prepped["bl"].shape[1]
    Hl = H // 4

    bn = min(block_n, N)
    Np = ((N + bn - 1) // bn) * bn

    # Input as (N, H, W*Cin) slab: rows = h, lanes = (w, c) with c minor.
    x_slab = jnp.transpose(x_nchw, (0, 2, 3, 1)).reshape(N, H, W * Cin)
    if Np != N:
        x_slab = jnp.concatenate(
            [x_slab, jnp.zeros((Np - N, H, W * Cin), x_slab.dtype)], axis=0)

    kernel = functools.partial(_c1_kernel, H=H, W=W, Cin=Cin, C1=C1, C2=C2)
    out = pl.pallas_call(
        kernel,
        out_shape=jax.ShapeDtypeStruct((Np, Kp), jnp.float32),
        grid=(Np // bn,),
        in_specs=[
            pl.BlockSpec((bn, H, W * Cin), lambda n: (n, 0, 0)),
            pl.BlockSpec(prepped["w1"].shape, lambda n: (0, 0)),
            pl.BlockSpec(prepped["b1"].shape, lambda n: (0, 0)),
            pl.BlockSpec(prepped["w2"].shape, lambda n: (0, 0)),
            pl.BlockSpec(prepped["b2"].shape, lambda n: (0, 0)),
            pl.BlockSpec((Hl,) + prepped["wl"].shape[1:], lambda n: (0, 0, 0)),
            pl.BlockSpec(prepped["bl"].shape, lambda n: (0, 0)),
        ],
        out_specs=pl.BlockSpec((bn, Kp), lambda n: (n, 0)),
        compiler_params=pltpu.CompilerParams(dimension_semantics=("parallel",)),
    )(x_slab, prepped["w1"], prepped["b1"], prepped["w2"], prepped["b2"],
      prepped["wl"], prepped["bl"])
    return out[:N, :num_classes]


# ------------------------------- init + f32 reference --------------------------------------

def init_params(key, in_channels=1, num_classes=10, spatial=16):
    k = jax.random.split(key, 6)
    s = 0.1
    lat_dim = 4 * (spatial // 4) * (spatial // 4)
    return {
        "w1": s * jax.random.normal(k[0], (16, in_channels, 3, 3), jnp.float32),
        "b1": s * jax.random.normal(k[1], (16,), jnp.float32),
        "w2": s * jax.random.normal(k[2], (4, 16, 3, 3), jnp.float32),
        "b2": s * jax.random.normal(k[3], (4,), jnp.float32),
        "wl": s * jax.random.normal(k[4], (lat_dim, num_classes), jnp.float32),
        "bl": s * jax.random.normal(k[5], (num_classes,), jnp.float32),
    }


def reference_forward(params, x_nchw):
    def conv_relu(x, w, b):
        y = lax.conv_general_dilated(x, w, window_strides=(1, 1), padding="SAME",
                                     dimension_numbers=("NCHW", "OIHW", "NCHW"))
        return jax.nn.relu(y + b[None, :, None, None])

    def pool(x):
        return lax.reduce_window(x, -jnp.inf, lax.max,
                                 (1, 1, 2, 2), (1, 1, 2, 2), "VALID")

    h = pool(conv_relu(x_nchw, params["w1"], params["b1"]))
    h = pool(conv_relu(h, params["w2"], params["b2"]))
    flat = h.reshape(h.shape[0], -1)
    return flat @ params["wl"] + params["bl"][None, :]


# ---------------------------------------- main ---------------------------------------------

if __name__ == "__main__":
    key = jax.random.PRNGKey(0)
    k_x, k_p = jax.random.split(key)

    N, C, H, W = 16, 1, 16, 16     # MNIST-like single-channel input, small spatial size
    x = jax.random.normal(k_x, (N, C, H, W), jnp.float32)
    params = init_params(k_p, in_channels=C, num_classes=10, spatial=H)

    prepped = prepare_c1_params(params, H, W)          # one-time weight re-layout
    fwd = jax.jit(c1_forward, static_argnames=("num_classes", "block_n"))

    out = fwd(prepped, x, num_classes=10, block_n=8)
    out = jax.block_until_ready(out)
    assert out.shape == (N, 10) and out.dtype == jnp.float32

    ref = reference_forward(params, x)
    err = float(jnp.max(jnp.abs(out - ref)))
    assert err < 5e-2, f"max abs error vs f32 reference: {err}"

    print("KERNEL_OK")
</pallas_src>

<mosaic_0001>
module attributes {stable_mosaic.version = 11 : i64} {
  func.func @_c1_kernel(%arg0: i32, %arg1: memref<8x16x16xf32, #tpu.memory_space<vmem>>, %arg2: memref<54x256xbf16, #tpu.memory_space<vmem>>, %arg3: memref<1x128xf32, #tpu.memory_space<vmem>>, %arg4: memref<480x32xbf16, #tpu.memory_space<vmem>>, %arg5: memref<1x16xf32, #tpu.memory_space<vmem>>, %arg6: memref<4x16x128xbf16, #tpu.memory_space<vmem>>, %arg7: memref<1x128xf32, #tpu.memory_space<vmem>>, %arg8: memref<8x128xf32, #tpu.memory_space<vmem>>) attributes {dimension_semantics = [#tpu.dimension_semantics<parallel>], iteration_bounds = array<i64: 2>, scalar_prefetch = 0 : i64, scratch_operands = 0 : i64, tpu.core_type = #tpu.core_type<tc>, window_params = [{transform_indices = @transform_0, window_bounds = array<i64: 8, 16, 16>}, {pipeline_mode = #tpu.pipeline_mode<synchronous>, transform_indices = @transform_1, window_bounds = array<i64: 54, 256>}, {pipeline_mode = #tpu.pipeline_mode<synchronous>, transform_indices = @transform_2, window_bounds = array<i64: 1, 128>}, {pipeline_mode = #tpu.pipeline_mode<synchronous>, transform_indices = @transform_3, window_bounds = array<i64: 480, 32>}, {pipeline_mode = #tpu.pipeline_mode<synchronous>, transform_indices = @transform_4, window_bounds = array<i64: 1, 16>}, {pipeline_mode = #tpu.pipeline_mode<synchronous>, transform_indices = @transform_5, window_bounds = array<i64: 4, 16, 128>}, {pipeline_mode = #tpu.pipeline_mode<synchronous>, transform_indices = @transform_6, window_bounds = array<i64: 1, 128>}, {transform_indices = @transform_7, window_bounds = array<i64: 8, 128>}]} {
    %c0 = arith.constant 0 : index
    %c0_0 = arith.constant 0 : index
    %c0_1 = arith.constant 0 : index
    %0 = vector.load %arg1[%c0, %c0_0, %c0_1] : memref<8x16x16xf32, #tpu.memory_space<vmem>>, vector<8x16x16xf32>
    %cst = arith.constant 0.000000e+00 : f32
    %1 = vector.broadcast %cst : f32 to vector<8x16x1xf32>
    %2 = tpu.concatenate %1, %0, %1 in 2 : vector<8x16x1xf32>, vector<8x16x16xf32>, vector<8x16x1xf32> -> vector<8x16x18xf32>
    %cst_2 = arith.constant 0.000000e+00 : f32
    %3 = vector.broadcast %cst_2 : f32 to vector<8x1x18xf32>
    %4 = tpu.concatenate %3, %2, %3 in 1 : vector<8x1x18xf32>, vector<8x16x18xf32>, vector<8x1x18xf32> -> vector<8x18x18xf32>
    %5 = vector.extract_strided_slice %4 {offsets = [0, 0, 0], sizes = [8, 16, 18], strides = [1, 1, 1]} : vector<8x18x18xf32> to vector<8x16x18xf32>
    %6 = vector.extract_strided_slice %4 {offsets = [0, 1, 0], sizes = [8, 16, 18], strides = [1, 1, 1]} : vector<8x18x18xf32> to vector<8x16x18xf32>
    %7 = vector.extract_strided_slice %4 {offsets = [0, 2, 0], sizes = [8, 16, 18], strides = [1, 1, 1]} : vector<8x18x18xf32> to vector<8x16x18xf32>
    %8 = tpu.concatenate %5, %6, %7 in 2 : vector<8x16x18xf32>, vector<8x16x18xf32>, vector<8x16x18xf32> -> vector<8x16x54xf32>
    %9 = vector.shape_cast %8 : vector<8x16x54xf32> to vector<128x54xf32>
    %10 = arith.truncf %9 : vector<128x54xf32> to vector<128x54xbf16>
    %c0_3 = arith.constant 0 : index
    %c0_4 = arith.constant 0 : index
    %11 = vector.load %arg2[%c0_3, %c0_4] : memref<54x256xbf16, #tpu.memory_space<vmem>>, vector<54x256xbf16>
    %cst_5 = arith.constant dense<0.000000e+00> : vector<128x256xf32>
    %12 = tpu.matmul %10, %11, %cst_5 {dimension_numbers = #tpu.dot_dimension_numbers<[1], [0], [0], [1], [0, 0, 1, 1], [], []>} : vector<128x54xbf16>, vector<54x256xbf16>, vector<128x256xf32> -> vector<128x256xf32>
    %13 = vector.extract_strided_slice %12 {offsets = [0, 0], sizes = [128, 128], strides = [1, 1]} : vector<128x256xf32> to vector<128x128xf32>
    %14 = vector.extract_strided_slice %12 {offsets = [0, 128], sizes = [128, 128], strides = [1, 1]} : vector<128x256xf32> to vector<128x128xf32>
    %15 = arith.maximumf %13, %14 : vector<128x128xf32>
    %16 = vector.shape_cast %15 : vector<128x128xf32> to vector<64x2x128xf32>
    %17 = vector.extract_strided_slice %16 {offsets = [0, 0, 0], sizes = [64, 1, 128], strides = [1, 1, 1]} : vector<64x2x128xf32> to vector<64x1x128xf32>
    %18 = vector.shape_cast %17 : vector<64x1x128xf32> to vector<64x128xf32>
    %19 = vector.extract_strided_slice %16 {offsets = [0, 1, 0], sizes = [64, 1, 128], strides = [1, 1, 1]} : vector<64x2x128xf32> to vector<64x1x128xf32>
    %20 = vector.shape_cast %19 : vector<64x1x128xf32> to vector<64x128xf32>
    %21 = arith.maximumf %18, %20 : vector<64x128xf32>
    %22 = vector.shape_cast %21 : vector<64x128xf32> to vector<8x8x128xf32>
    %c0_6 = arith.constant 0 : index
    %c0_7 = arith.constant 0 : index
    %23 = vector.load %arg3[%c0_6, %c0_7] : memref<1x128xf32, #tpu.memory_space<vmem>>, vector<1x128xf32>
    %24 = vector.shape_cast %23 : vector<1x128xf32> to vector<1x1x128xf32>
    %25 = vector.broadcast %24 : vector<1x1x128xf32> to vector<8x8x128xf32>
    %26 = arith.addf %22, %25 : vector<8x8x128xf32>
    %cst_8 = arith.constant 0.000000e+00 : f32
    %27 = vector.broadcast %cst_8 : f32 to vector<8x8x128xf32>
    %28 = arith.maximumf %26, %27 : vector<8x8x128xf32>
    %cst_9 = arith.constant 0.000000e+00 : f32
    %29 = vector.broadcast %cst_9 : f32 to vector<8x8x16xf32>
    %30 = tpu.concatenate %29, %28, %29 in 2 : vector<8x8x16xf32>, vector<8x8x128xf32>, vector<8x8x16xf32> -> vector<8x8x160xf32>
    %cst_10 = arith.constant 0.000000e+00 : f32
    %31 = vector.broadcast %cst_10 : f32 to vector<8x1x160xf32>
    %32 = tpu.concatenate %31, %30, %31 in 1 : vector<8x1x160xf32>, vector<8x8x160xf32>, vector<8x1x160xf32> -> vector<8x10x160xf32>
    %33 = vector.extract_strided_slice %32 {offsets = [0, 0, 0], sizes = [8, 8, 160], strides = [1, 1, 1]} : vector<8x10x160xf32> to vector<8x8x160xf32>
    %34 = vector.extract_strided_slice %32 {offsets = [0, 1, 0], sizes = [8, 8, 160], strides = [1, 1, 1]} : vector<8x10x160xf32> to vector<8x8x160xf32>
    %35 = vector.extract_strided_slice %32 {offsets = [0, 2, 0], sizes = [8, 8, 160], strides = [1, 1, 1]} : vector<8x10x160xf32> to vector<8x8x160xf32>
    %36 = tpu.concatenate %33, %34, %35 in 2 : vector<8x8x160xf32>, vector<8x8x160xf32>, vector<8x8x160xf32> -> vector<8x8x480xf32>
    %37 = vector.shape_cast %36 : vector<8x8x480xf32> to vector<64x480xf32>
    %38 = arith.truncf %37 : vector<64x480xf32> to vector<64x480xbf16>
    %c0_11 = arith.constant 0 : index
    %c0_12 = arith.constant 0 : index
    %39 = vector.load %arg4[%c0_11, %c0_12] : memref<480x32xbf16, #tpu.memory_space<vmem>>, vector<480x32xbf16>
    %cst_13 = arith.constant dense<0.000000e+00> : vector<64x32xf32>
    %40 = tpu.matmul %38, %39, %cst_13 {dimension_numbers = #tpu.dot_dimension_numbers<[1], [0], [0], [1], [0, 0, 1, 1], [], []>} : vector<64x480xbf16>, vector<480x32xbf16>, vector<64x32xf32> -> vector<64x32xf32>
    %41 = vector.extract_strided_slice %40 {offsets = [0, 0], sizes = [64, 16], strides = [1, 1]} : vector<64x32xf32> to vector<64x16xf32>
    %42 = vector.extract_strided_slice %40 {offsets = [0, 16], sizes = [64, 16], strides = [1, 1]} : vector<64x32xf32> to vector<64x16xf32>
    %43 = arith.maximumf %41, %42 : vector<64x16xf32>
    %44 = vector.shape_cast %43 : vector<64x16xf32> to vector<32x2x16xf32>
    %45 = vector.extract_strided_slice %44 {offsets = [0, 0, 0], sizes = [32, 1, 16], strides = [1, 1, 1]} : vector<32x2x16xf32> to vector<32x1x16xf32>
    %46 = vector.shape_cast %45 : vector<32x1x16xf32> to vector<32x16xf32>
    %47 = vector.extract_strided_slice %44 {offsets = [0, 1, 0], sizes = [32, 1, 16], strides = [1, 1, 1]} : vector<32x2x16xf32> to vector<32x1x16xf32>
    %48 = vector.shape_cast %47 : vector<32x1x16xf32> to vector<32x16xf32>
    %49 = arith.maximumf %46, %48 : vector<32x16xf32>
    %50 = vector.shape_cast %49 : vector<32x16xf32> to vector<8x4x16xf32>
    %c0_14 = arith.constant 0 : index
    %c0_15 = arith.constant 0 : index
    %51 = vector.load %arg5[%c0_14, %c0_15] : memref<1x16xf32, #tpu.memory_space<vmem>>, vector<1x16xf32>
    %52 = vector.shape_cast %51 : vector<1x16xf32> to vector<1x1x16xf32>
    %53 = vector.broadcast %52 : vector<1x1x16xf32> to vector<8x4x16xf32>
    %54 = arith.addf %50, %53 : vector<8x4x16xf32>
    %cst_16 = arith.constant 0.000000e+00 : f32
    %55 = vector.broadcast %cst_16 : f32 to vector<8x4x16xf32>
    %56 = arith.maximumf %54, %55 : vector<8x4x16xf32>
    %57 = vector.extract_strided_slice %56 {offsets = [0, 0, 0], sizes = [8, 1, 16], strides = [1, 1, 1]} : vector<8x4x16xf32> to vector<8x1x16xf32>
    %58 = vector.shape_cast %57 : vector<8x1x16xf32> to vector<8x16xf32>
    %59 = arith.truncf %58 : vector<8x16xf32> to vector<8x16xbf16>
    %c0_17 = arith.constant 0 : index
    %c0_18 = arith.constant 0 : index
    %c0_19 = arith.constant 0 : index
    %60 = vector.load %arg6[%c0_17, %c0_18, %c0_19] : memref<4x16x128xbf16, #tpu.memory_space<vmem>>, vector<1x16x128xbf16>
    %61 = vector.shape_cast %60 : vector<1x16x128xbf16> to vector<16x128xbf16>
    %cst_20 = arith.constant dense<0.000000e+00> : vector<8x128xf32>
    %62 = tpu.matmul %59, %61, %cst_20 {dimension_numbers = #tpu.dot_dimension_numbers<[1], [0], [0], [1], [0, 0, 1, 1], [], []>} : vector<8x16xbf16>, vector<16x128xbf16>, vector<8x128xf32> -> vector<8x128xf32>
    %63 = vector.extract_strided_slice %56 {offsets = [0, 1, 0], sizes = [8, 1, 16], strides = [1, 1, 1]} : vector<8x4x16xf32> to vector<8x1x16xf32>
    %64 = vector.shape_cast %63 : vector<8x1x16xf32> to vector<8x16xf32>
    %65 = arith.truncf %64 : vector<8x16xf32> to vector<8x16xbf16>
    %c1 = arith.constant 1 : index
    %c0_21 = arith.constant 0 : index
    %c0_22 = arith.constant 0 : index
    %66 = vector.load %arg6[%c1, %c0_21, %c0_22] : memref<4x16x128xbf16, #tpu.memory_space<vmem>>, vector<1x16x128xbf16>
    %67 = vector.shape_cast %66 : vector<1x16x128xbf16> to vector<16x128xbf16>
    %cst_23 = arith.constant dense<0.000000e+00> : vector<8x128xf32>
    %68 = tpu.matmul %65, %67, %cst_23 {dimension_numbers = #tpu.dot_dimension_numbers<[1], [0], [0], [1], [0, 0, 1, 1], [], []>} : vector<8x16xbf16>, vector<16x128xbf16>, vector<8x128xf32> -> vector<8x128xf32>
    %69 = arith.addf %62, %68 : vector<8x128xf32>
    %70 = vector.extract_strided_slice %56 {offsets = [0, 2, 0], sizes = [8, 1, 16], strides = [1, 1, 1]} : vector<8x4x16xf32> to vector<8x1x16xf32>
    %71 = vector.shape_cast %70 : vector<8x1x16xf32> to vector<8x16xf32>
    %72 = arith.truncf %71 : vector<8x16xf32> to vector<8x16xbf16>
    %c2 = arith.constant 2 : index
    %c0_24 = arith.constant 0 : index
    %c0_25 = arith.constant 0 : index
    %73 = vector.load %arg6[%c2, %c0_24, %c0_25] : memref<4x16x128xbf16, #tpu.memory_space<vmem>>, vector<1x16x128xbf16>
    %74 = vector.shape_cast %73 : vector<1x16x128xbf16> to vector<16x128xbf16>
    %cst_26 = arith.constant dense<0.000000e+00> : vector<8x128xf32>
    %75 = tpu.matmul %72, %74, %cst_26 {dimension_numbers = #tpu.dot_dimension_numbers<[1], [0], [0], [1], [0, 0, 1, 1], [], []>} : vector<8x16xbf16>, vector<16x128xbf16>, vector<8x128xf32> -> vector<8x128xf32>
    %76 = arith.addf %69, %75 : vector<8x128xf32>
    %77 = vector.extract_strided_slice %56 {offsets = [0, 3, 0], sizes = [8, 1, 16], strides = [1, 1, 1]} : vector<8x4x16xf32> to vector<8x1x16xf32>
    %78 = vector.shape_cast %77 : vector<8x1x16xf32> to vector<8x16xf32>
    %79 = arith.truncf %78 : vector<8x16xf32> to vector<8x16xbf16>
    %c3 = arith.constant 3 : index
    %c0_27 = arith.constant 0 : index
    %c0_28 = arith.constant 0 : index
    %80 = vector.load %arg6[%c3, %c0_27, %c0_28] : memref<4x16x128xbf16, #tpu.memory_space<vmem>>, vector<1x16x128xbf16>
    %81 = vector.shape_cast %80 : vector<1x16x128xbf16> to vector<16x128xbf16>
    %cst_29 = arith.constant dense<0.000000e+00> : vector<8x128xf32>
    %82 = tpu.matmul %79, %81, %cst_29 {dimension_numbers = #tpu.dot_dimension_numbers<[1], [0], [0], [1], [0, 0, 1, 1], [], []>} : vector<8x16xbf16>, vector<16x128xbf16>, vector<8x128xf32> -> vector<8x128xf32>
    %83 = arith.addf %76, %82 : vector<8x128xf32>
    %c0_30 = arith.constant 0 : index
    %c0_31 = arith.constant 0 : index
    %84 = vector.load %arg7[%c0_30, %c0_31] : memref<1x128xf32, #tpu.memory_space<vmem>>, vector<1x128xf32>
    %85 = vector.broadcast %84 : vector<1x128xf32> to vector<8x128xf32>
    %86 = arith.addf %83, %85 : vector<8x128xf32>
    %c0_32 = arith.constant 0 : index
    %c0_33 = arith.constant 0 : index
    %87 = vector.load %arg8[%c0_32, %c0_33] : memref<8x128xf32, #tpu.memory_space<vmem>>, vector<8x128xf32>
    tpu.vector_store %arg8[%c0_32, %c0_33], %86 {strides = array<i32>} : memref<8x128xf32, #tpu.memory_space<vmem>>, vector<8x128xf32>,
    return
  }
  func.func @transform_0(%arg0: i32) -> (i32, i32, i32) {
    %c0_i32 = arith.constant 0 : i32
    %c0_i32_0 = arith.constant 0 : i32
    %c0_i32_1 = arith.constant 0 : i32
    return %arg0, %c0_i32, %c0_i32_0 : i32, i32, i32
  }
  func.func @transform_1(%arg0: i32) -> (i32, i32) {
    %c0_i32 = arith.constant 0 : i32
    %c0_i32_0 = arith.constant 0 : i32
    %c0_i32_1 = arith.constant 0 : i32
    return %c0_i32, %c0_i32_0 : i32, i32
  }
  func.func @transform_2(%arg0: i32) -> (i32, i32) {
    %c0_i32 = arith.constant 0 : i32
    %c0_i32_0 = arith.constant 0 : i32
    %c0_i32_1 = arith.constant 0 : i32
    return %c0_i32, %c0_i32_0 : i32, i32
  }
  func.func @transform_3(%arg0: i32) -> (i32, i32) {
    %c0_i32 = arith.constant 0 : i32
    %c0_i32_0 = arith.constant 0 : i32
    %c0_i32_1 = arith.constant 0 : i32
    return %c0_i32, %c0_i32_0 : i32, i32
  }
  func.func @transform_4(%arg0: i32) -> (i32, i32) {
    %c0_i32 = arith.constant 0 : i32
    %c0_i32_0 = arith.constant 0 : i32
    %c0_i32_1 = arith.constant 0 : i32
    return %c0_i32, %c0_i32_0 : i32, i32
  }
  func.func @transform_5(%arg0: i32) -> (i32, i32, i32) {
    %c0_i32 = arith.constant 0 : i32
    %c0_i32_0 = arith.constant 0 : i32
    %c0_i32_1 = arith.constant 0 : i32
    %c0_i32_2 = arith.constant 0 : i32
    return %c0_i32, %c0_i32_0, %c0_i32_1 : i32, i32, i32
  }
  func.func @transform_6(%arg0: i32) -> (i32, i32) {
    %c0_i32 = arith.constant 0 : i32
    %c0_i32_0 = arith.constant 0 : i32
    %c0_i32_1 = arith.constant 0 : i32
    return %c0_i32, %c0_i32_0 : i32, i32
  }
  func.func @transform_7(%arg0: i32) -> (i32, i32) {
    %c0_i32 = arith.constant 0 : i32
    %c0_i32_0 = arith.constant 0 : i32
    return %arg0, %c0_i32 : i32, i32
  }
}

</mosaic_0001>

<bundles_post_ra>
// kernel: c1_forward.1
= control target key start
LH: loop header
LB: loop body
LE: loop exit
PB: predicated region body
PF: predicated region fallthrough
CT: control target
= control target key end

     0   :  { %12 = vsyncpa [#allocation3], 0  ;;  %s5896_s0 = inlined_call_operand.vmem [shape: f32[16,16,16], index: 0, kind: input, shape index: {}]   ;;  %s5897_s1 = inlined_call_operand.vmem [shape: bf16[54,256], index: 1, kind: input, shape index: {}]   ;;  %s5898_s2 = inlined_call_operand.vmem [shape: f32[1,128], index: 2, kind: input, shape index: {}]   ;;  %s5899_s3 = inlined_call_operand.vmem [shape: bf16[480,32], index: 3, kind: input, shape index: {}]   ;;  %s5900_s4 = inlined_call_operand.vmem [shape: f32[1,16], index: 4, kind: input, shape index: {}]   ;;  %s5901_s5 = inlined_call_operand.hbm [shape: bf16[4,16,128], index: 5, kind: input, shape index: {}]   ;;  %s5902_s6 = inlined_call_operand.vmem [shape: f32[1,128], index: 6, kind: input, shape index: {}]   ;;  %s5903_s7 = inlined_call_operand.hbm [shape: f32[16,128], index: 7, kind: output, shape index: {}]  }
   0x1   :  { %13 = vsyncpa [#allocation4], 0 }
   0x2   :  { %15 = vsyncpa [#allocation4 + $0x1], 0  ;;  %s4495_s24 = smov 0   ;;  %s4497_s25 = smov 0  }
   0x3   :  { %s4499_s26 = smov 0   ;;  %s4501_s27 = smov 0  }
   0x4 LB: > { %s4516_s28 = sadd.s32 4294967295, %s4438_s27   ;;  %s3751_s29 = sadd.s32 4294967294, %s4438_s27   ;;  %s4438_s27 = sphi %s4501_s27, %s5934_s27   ;;  %s4434_s26 = sphi %s4499_s26, %s5933_s26   ;;  %s4430_s25 = sphi %s4497_s25, %s5932_s25   ;;  %s4426_s24 = sphi %s4495_s24, %s5931_s24  }
   0x5   : > { %s4520_s30 = sadd.s32 1, %s4438_s27   ;;  %s180_s8 = sadd.s32 1, %s4434_s26 }
   0x6   : > { %s177_s9 = ssub.s32 %s4438_s27, %s4520_s30  ;;  %p190_p0 = scmp.ne.s32.totalorder %s4434_s26, %s4430_s25 }
   0x7   : > { %p178_p1 = scmp.eq.s32.totalorder %s177_s9, 0  ;;  %p191_p2 = scmp.eq.s32.totalorder %s4516_s28, 1 }
   0x8   : > { %p196_p3 = scmp.ne.s32.totalorder %s4430_s25, %s4426_s24  ;;  %p197_p4 = scmp.eq.s32.totalorder %s3751_s29, 1 }
   0x9   : > { %s4531_s10 = scalar_select %p178_p1, %s4434_s26, %s180_s8  }
   0xa   : > { %p4533_p5 = por %p191_p2, %p190_p0  ;;  %p4537_p6 = por %p197_p4, %p196_p3 }
   0xb   : > { %p3752_p7 = scmp.ge.s32.totalorder %s4438_s27, 1  ;;  %p204_p8 = scmp.lt.s32.totalorder %s4438_s27, 3 }
   0xc   : > { %s5909_s11 = scalar_select %p4533_p5, 1, 0 }
   0xd   : > { %s5910_s12 = scalar_select %p4537_p6, 1, 0 }
   0xe   : > { %p5904_p9 = scmp.eq.s32.totalorder %s4516_s28, 0  ;;  %p4544_p10 = pnand %p3752_p7, %p204_p8 }
   0xf   : > { %s4440_s14 = smov [#allocation2]   ;;  %s4344_s19 = scalar_lea.hbm %s5901_s5, 512 }
  0x10   : > { %s5911_s13 = scalar_select %p4544_p10, 1, 0 }
  0x11   : > { %s228_s15 = sshll.u32 %s4440_s14, 4  ;;  %p4022_p11 = pneg %p4544_p10  ;;  %s229_s15 = int_to_ptr.vmem [resolvable:$true] %s228_s15 }
  0x12   : > { %p4345_p13 = scmp.ne.s32.totalorder %s5901_s5, %s4344_s19  ;;  %p4351_p3 = scmp.lt.u32.totalorder %s4344_s19, %s5901_s5 }
  0x13   : > { %p4552_p12 = pnand %p5904_p9, %p4022_p11 }
  0x15   : > { %p4346_p0 = pneg %p4552_p12 }
  0x17   : > { %p4347_p1 = pnand %p4346_p0, %p4345_p13 }
  0x19   : > { %p4348_p2 = pneg %p4347_p1 }
  0x1b   : > { %p4353_p4 = pnand %p4351_p3, %p4348_p2 }
  0x1d   : > { %4356 = shalt.err (!%p4353_p4)
}
  0x1e   : > { %s4357_s29 = scalar_lea.vmem %s229_s15, 512  ;;  %p4365_p9 = scmp.lt.s32.totalorder %s229_s15, %s229_s15 }
  0x1f   : > { %p4358_p7 = scmp.ne.s32.totalorder %s229_s15, %s4357_s29  ;;  %p4366_p6 = scmp.lt.s32.totalorder %s4357_s29, %s4357_s29 }
  0x21   : > { %p4360_p8 = pnand %p4358_p7, %p4346_p0  ;;  %p4367_p5 = por %p4366_p6, %p4365_p9 }
  0x23   : > { %p4361_p11 = pneg %p4360_p8 }
  0x25   : > { %p4368_p10 = pnand %p4367_p5, %p4361_p11 }
  0x27   : > { %4371 = shalt.err (!%p4368_p10)
}
  0x28   : > { %s4441_s8 = smov 64   ;;  %s4442_s9 = smov 4  }
  0x29   : > { %4025 = dma.hbm_to_vmem [thread:$0]  (!%p4552_p12), %s5901_s5, 512, %s229_s15, [#allocation3], %s4441_s8, %s4441_s8, %s4442_s9  }
  0x2a   : > { %p5913_p13 = scmp.ne.s32.totalorder %s5911_s13, 0 }
  0x2c   : > { %257 = sbr.rel (%p5913_p13) target bundleno = 1532 (0x5fc), region = 48 }
  0x33   : > { %p5914_p1 = scmp.eq.s32.totalorder %s4516_s28, 0 }
  0x35   : > { %4417 = dma.done.wait (%p5914_p1), [#allocation3], 512   ;;  %p5915_p0 = pmov %p5914_p1 }
  0x36   : > { %s3758_s18 = sshll.u32 %s4516_s28, 3  ;;  %s4443_s13 = smov 1   ;;  %v4299_v24 = vld [vmem:[%s5897_s1 + $0x4] ss:$8 sps:$4 sm:$0xff]   ;;  %v4301_v25 = vld [vmem:[%s5897_s1] ss:$8 sps:$4 sm:$0xff]  }
  0x37   : > { %4419 = vsyncadd (%p5915_p0), [#allocation3], 4294966784  ;;  %p291_p5 = scmp.lt.s32.totalorder %s3758_s18, 15  ;;  %v4302_v26 = vld [vmem:[%s5897_s1 + $0x14] ss:$8 sps:$4 sm:$0xff]   ;;  %803 = vmatprep.subr.bf16.mxu0 %v4299_v24  ;;  %vm378_vm0 = vcmask 7168  }
  0x38   : > { %804 = vmatpush1.bf16.msra.mxu0 %v4301_v25  ;;  %v4304_v27 = vld [vmem:[%s5897_s1 + $0x10] ss:$8 sps:$4 sm:$0xff]   ;;  %v4305_v28 = vld [vmem:[%s5897_s1 + $0x24] ss:$8 sps:$4 sm:$0xff]   ;;  %v4307_v29 = vld [vmem:[%s5897_s1 + $0x20] ss:$8 sps:$4 sm:$0xff]  }
  0x39   : > { %s5936_s18 = smov (!%p291_p5, %s3758_s18), 15  ;;  %805 = vmatprep.subr.bf16.mxu0 %v4302_v26  ;;  %vm395_vm1 = vcmask 138240   ;;  %vm428_vm2 = vcmask 1040384   ;;  %vm598_vm3 = vcmask 1045504   ;;  %vm509_vm4 = vcmask 1046528   ;;  %s4448_s8 = smov 16  }
  0x3a   : > { %s3943_s19 = sshll.u32 %s5936_s18, 4  ;;  %vm796_vm5 = vcmask 1042432   ;;  %vm687_vm6 = vcmask 146432   ;;  %vm704_vm7 = vcmask 293888   ;;  %vm771_vm8 = vcmask 441344   ;;  %s4450_s20 = smov 64  }
  0x3b   : > { %s295_s21 = scalar_lea.vmem %s5896_s0, %s3943_s19  ;;  %vm2023_vm9 = vcmask 1041409   ;;  %vm2025_vm10 = vcmask 1042434   ;;  %vm2027_vm11 = vcmask 1043459   ;;  %vm2029_vm12 = vcmask 1044484   ;;  %s4449_s19 = smov 32  }
  0x3c   : > { %v298_v0 = vld [vmem:[%s295_s21] sm:$0xff]  ;;  %v299_v1 = vld [vmem:[%s295_s21 + $0x8] sm:$0xff]  ;;  %v300_v2 = vld [vmem:[%s295_s21 + $0x10] sm:$0xff]  ;;  %806 = vmatpush1.bf16.msra.mxu0 %v4304_v27  ;;  %vm2031_vm13 = vcmask 1045509   ;;  %vm2033_vm14 = vcmask 1046534   ;;  %vm2035_vm15 = vcmask 1047559  }
  0x3d   : > { %v4079_v3 = vpack.i.bf16 %v299_v1, %v298_v0  ;;  %v301_v4 = vld [vmem:[%s295_s21 + $0x18] sm:$0xff]  ;;  %v302_v5 = vld [vmem:[%s295_s21 + $0x20] sm:$0xff]  ;;  %v303_v6 = vld [vmem:[%s295_s21 + $0x28] sm:$0xff]  ;;  %807 = vmatprep.subr.bf16.mxu0 %v4305_v28  ;;  %s4451_s16 = smov 112   ;;  %s287_s15 = sand.u32 1, %s4430_s25  }
  0x3e   : > { %v4089_v7 = vpack.i.bf16 %v303_v6, %v302_v5  ;;  %v304_v8 = vld [vmem:[%s295_s21 + $0x30] sm:$0xff]  ;;  %v305_v9 = vld [vmem:[%s295_s21 + $0x38] sm:$0xff]  ;;  %v4084_v10 = vpack.i.bf16 %v301_v4, %v300_v2  ;;  %v306_v12 = vld [vmem:[%s295_s21 + $0x40] sm:$0xff]  ;;  %s3757_s22 = sshll.u32 %s287_s15, 3  ;;  %p5929_p9 = scmp.ne.s32.totalorder %s5909_s11, 0 }
  0x3f   : > { %4080 = vrot.lane.b32.xlu0 %v4079_v3, %s4443_s13  ;;  %v4094_v11 = vpack.i.bf16 %v305_v9, %v304_v8  ;;  %v307_v13 = vld [vmem:[%s295_s21 + $0x48] sm:$0xff]  ;;  %v308_v14 = vld [vmem:[%s295_s21 + $0x50] sm:$0xff]  ;;  %v309_v15 = vld [vmem:[%s295_s21 + $0x58] sm:$0xff]  ;;  %s289_s9 = scalar_lea.vmem [#allocation5], %s3757_s22 }
  0x40   : > { %4090 = vrot.lane.b32.xlu1 %v4089_v7, %s4443_s13  ;;  %v310_v16 = vld [vmem:[%s295_s21 + $0x60] sm:$0xff]  ;;  %v311_v17 = vld [vmem:[%s295_s21 + $0x68] sm:$0xff]  ;;  %v4099_v18 = vpack.i.bf16 %v307_v13, %v306_v12  ;;  %v312_v19 = vld [vmem:[%s295_s21 + $0x70] sm:$0xff]  ;;  %v4104_v20 = vpack.i.bf16 %v309_v15, %v308_v14  ;;  %808 = vmatpush1.bf16.msra.mxu0 %v4307_v29  ;;  %s3680_s14 = sshll.u32 %s289_s9, 4  ;;  %s5856_s14 = int_to_ptr.vmem [resolvable:$true] %s3680_s14 }
  0x41   : > { %v313_v21 = vld [vmem:[%s295_s21 + $0x78] sm:$0xff]  ;;  %v4109_v22 = vpack.i.bf16 %v311_v17, %v310_v16  ;;  %s4444_s21 = smov 36  }
  0x42   : > { %v4114_v23 = vpack.i.bf16 %v313_v21, %v312_v19 }
  0x43   : > { %4085 = vrot.lane.b32.xlu0 %v4084_v10, %s4443_s13 }
  0x44   : > { %4095 = vrot.lane.b32.xlu1 %v4094_v11, %s4443_s13 }
  0x47   : > { %4100 = vrot.lane.b32.xlu0 %v4099_v18, %s4443_s13 }
  0x48   : > { %4105 = vrot.lane.b32.xlu1 %v4104_v20, %s4443_s13 }
  0x4b   : > { %4110 = vrot.lane.b32.xlu0 %v4109_v22, %s4443_s13 }
  0x4c   : > { %4115 = vrot.lane.b32.xlu1 %v4114_v23, %s4443_s13  ;;  %s4445_s13 = smov 18  }
  0xb1   : > { %v4081_v30 = vpop.permute.xlu0 %4080 }
  0xb2   : > { %v4083_v31 = vunpack.i.h.bf16 %v4081_v30  ;;  %v4082_v32 = vunpack.i.l.bf16 %v4081_v30  ;;  %v4091_v33 = vpop.permute.xlu1 %4090 }
  0xb3   : > { %v4093_v34 = vunpack.i.h.bf16 %v4091_v33  ;;  %v4092_v35 = vunpack.i.l.bf16 %v4091_v33 }
  0xb4   : > { %v380_v36 = vsel %vm378_vm0, 0.0, %v4083_v31  ;;  %v379_v37 = vsel %vm378_vm0, 0.0, %v4082_v32 }
  0xb5   : > { %v397_v38 = vsel %vm395_vm1, %v380_v36, 0.0  ;;  %v396_v39 = vsel %vm395_vm1, %v379_v37, 0.0  ;;  %v4086_v40 = vpop.permute.xlu0 %4085  ;;  %v384_v41 = vsel %vm378_vm0, 0.0, %v4093_v34  ;;  %v383_v42 = vsel %vm378_vm0, 0.0, %v4092_v35 }
  0xb6   : > { %v430_v43 = vrot.slane %v397_v38, 7  ;;  %v429_v44 = vrot.slane %v396_v39, 7  ;;  %v4088_v45 = vunpack.i.h.bf16 %v4086_v40  ;;  %v4087_v46 = vunpack.i.l.bf16 %v4086_v40  ;;  %v4096_v47 = vpop.permute.xlu1 %4095 }
  0xb7   : > { %v401_v48 = vsel %vm395_vm1, %v384_v41, 0.0  ;;  %v400_v49 = vsel %vm395_vm1, %v383_v42, 0.0  ;;  %v4098_v50 = vunpack.i.h.bf16 %v4096_v47  ;;  %v4097_v51 = vunpack.i.l.bf16 %v4096_v47 }
  0xb8   : > { %v485_v52 = vsel %vm428_vm2, %v430_v43, 0.0  ;;  %v4610_v53 = vsel %vm428_vm2, %v429_v44, %v430_v43  ;;  %v4613_v54 = vsel %vm428_vm2, 0.0, %v429_v44  ;;  %v382_v55 = vsel %vm378_vm0, 0.0, %v4088_v45 }
  0xb9   : > { %v513_v56 = vrot.slane %v485_v52, 1  ;;  %v602_v57 = vrot.slane %v485_v52, 2  ;;  %v510_v58 = vrot.slane %v4613_v54, 1  ;;  %v599_v59 = vrot.slane %v4613_v54, 2  ;;  %v4101_v16 = vpop.permute.xlu0 %4100 }
  0xba   : > { %v399_v60 = vsel %vm395_vm1, %v382_v55, 0.0  ;;  %v381_v61 = vsel %vm378_vm0, 0.0, %v4087_v46  ;;  %v436_v62 = vrot.slane %v401_v48, 7  ;;  %v435_v63 = vrot.slane %v400_v49, 7  ;;  %v4106_v41 = vpop.permute.xlu1 %4105 }
  0xbb   : > { %v433_v0 = vrot.slane %v399_v60, 7  ;;  %v398_v1 = vsel %vm395_vm1, %v381_v61, 0.0  ;;  %v386_v2 = vsel %vm378_vm0, 0.0, %v4098_v50  ;;  %v385_v3 = vsel %vm378_vm0, 0.0, %v4097_v51 }
  0xbc   : > { %v432_v4 = vrot.slane %v398_v1, 7  ;;  %v4624_v5 = vsel %vm428_vm2, %v436_v62, 0.0  ;;  %v4627_v6 = vsel %vm428_vm2, %v435_v63, %v436_v62  ;;  %v4630_v7 = vsel %vm428_vm2, 0.0, %v435_v63 }
  0xbd   : > { %v486_v8 = vsel %vm428_vm2, %v433_v0, 0.0  ;;  %v523_v9 = vrot.slane %v4624_v5, 1  ;;  %v612_v10 = vrot.slane %v4624_v5, 2  ;;  %v520_v11 = vrot.slane %v4630_v7, 1 }
  0xbe   : > { %v518_v12 = vrot.slane %v486_v8, 1  ;;  %v607_v13 = vrot.slane %v486_v8, 2  ;;  %v4637_v14 = vsel %vm428_vm2, %v432_v4, %v433_v0  ;;  %v4640_v15 = vsel %vm428_vm2, 0.0, %v432_v4  ;;  %v4111_v4 = vpop.permute.xlu0 %4110 }
  0xbf   : > { %v515_v17 = vrot.slane %v4640_v15, 1  ;;  %v604_v18 = vrot.slane %v4640_v15, 2  ;;  %v609_v19 = vrot.slane %v4630_v7, 2  ;;  %v403_v20 = vsel %vm395_vm1, %v386_v2, 0.0 }
  0xc0   : > { %v439_v21 = vrot.slane %v403_v20, 7  ;;  %v402_v22 = vsel %vm395_vm1, %v385_v3, 0.0  ;;  %v600_v23 = vrot.slane %v4610_v53, 2  ;;  %v511_v24 = vrot.slane %v4610_v53, 1 }
  0xc1   : > { %v438_v25 = vrot.slane %v402_v22, 7  ;;  %v4103_v26 = vunpack.i.h.bf16 %v4101_v16  ;;  %v4102_v27 = vunpack.i.l.bf16 %v4101_v16  ;;  %v516_v28 = vrot.slane %v4637_v14, 1 }
  0xc2   : > { %v4651_v29 = vsel %vm428_vm2, %v439_v21, 0.0  ;;  %v601_v30 = vsel %vm598_vm3, %v599_v59, %v600_v23  ;;  %v603_v31 = vsel %vm598_vm3, %v600_v23, %v602_v57  ;;  %v512_v32 = vsel %vm509_vm4, %v510_v58, %v511_v24 }
  0xc3   : > { %v528_v33 = vrot.slane %v4651_v29, 1  ;;  %v617_v34 = vrot.slane %v4651_v29, 2  ;;  %v4659_v35 = vsel %vm428_vm2, %v438_v25, %v439_v21  ;;  %v4662_v36 = vsel %vm428_vm2, 0.0, %v438_v25 }
  0xc4   : > { %v525_v37 = vrot.slane %v4662_v36, 1  ;;  %v614_v38 = vrot.slane %v4662_v36, 2  ;;  %v4124_v39 = vpack.i.bf16 %v603_v31, %v601_v30  ;;  %v514_v40 = vsel %vm509_vm4, %v511_v24, %v513_v56 }
  0xc5   : > { %v4119_v42 = vpack.i.bf16 %v514_v40, %v512_v32  ;;  %v388_v43 = vsel %vm378_vm0, 0.0, %v4103_v26  ;;  %v387_v44 = vsel %vm378_vm0, 0.0, %v4102_v27  ;;  %v517_v45 = vsel %vm509_vm4, %v515_v17, %v516_v28  ;;  %v4116_v40 = vpop.permute.xlu1 %4115 }
  0xc6   : > { %4125 = vrot.lane.b32.xlu1 %v4124_v39, %s4444_s21  ;;  %v405_v46 = vsel %vm395_vm1, %v388_v43, 0.0  ;;  %v404_v47 = vsel %vm395_vm1, %v387_v44, 0.0  ;;  %v519_v48 = vsel %vm509_vm4, %v516_v28, %v518_v12  ;;  %v605_v49 = vrot.slane %v4637_v14, 2 }
  0xc7   : > { %4120 = vrot.lane.b32.xlu0 %v4119_v42, %s4445_s13  ;;  %v442_v50 = vrot.slane %v405_v46, 7  ;;  %v441_v51 = vrot.slane %v404_v47, 7  ;;  %v4129_v52 = vpack.i.bf16 %v519_v48, %v517_v45  ;;  %v4108_v55 = vunpack.i.h.bf16 %v4106_v41 }
  0xc8   : > { %v606_v56 = vsel %vm598_vm3, %v604_v18, %v605_v49  ;;  %v608_v57 = vsel %vm598_vm3, %v605_v49, %v607_v13  ;;  %v4107_v58 = vunpack.i.l.bf16 %v4106_v41  ;;  %v521_v59 = vrot.slane %v4627_v6, 1 }
  0xc9   : > { %v4680_v60 = vsel %vm428_vm2, %v442_v50, 0.0  ;;  %v4683_v61 = vsel %vm428_vm2, %v441_v51, %v442_v50  ;;  %v4686_v62 = vsel %vm428_vm2, 0.0, %v441_v51  ;;  %v4134_v63 = vpack.i.bf16 %v608_v57, %v606_v56 }
  0xca   : > { %v533_v0 = vrot.slane %v4680_v60, 1  ;;  %v622_v1 = vrot.slane %v4680_v60, 2  ;;  %v530_v2 = vrot.slane %v4686_v62, 1  ;;  %v619_v3 = vrot.slane %v4686_v62, 2 }
  0xcb   : > { %4130 = vrot.lane.b32.xlu0 %v4129_v52, %s4445_s13  ;;  %4135 = vrot.lane.b32.xlu1 %v4134_v63, %s4444_s21  ;;  %v390_v8 = vsel %vm378_vm0, 0.0, %v4108_v55  ;;  %v389_v12 = vsel %vm378_vm0, 0.0, %v4107_v58  ;;  %v522_v13 = vsel %vm509_vm4, %v520_v11, %v521_v59  ;;  %v524_v16 = vsel %vm509_vm4, %v521_v59, %v523_v9 }
  0xcc   : > { %v407_v17 = vsel %vm395_vm1, %v390_v8, 0.0  ;;  %v406_v18 = vsel %vm395_vm1, %v389_v12, 0.0  ;;  %v4139_v20 = vpack.i.bf16 %v524_v16, %v522_v13  ;;  %v610_v21 = vrot.slane %v4627_v6, 2 }
  0xcd   : > { %v445_v22 = vrot.slane %v407_v17, 7  ;;  %v444_v23 = vrot.slane %v406_v18, 7  ;;  %v4113_v24 = vunpack.i.h.bf16 %v4111_v4  ;;  %v4112_v25 = vunpack.i.l.bf16 %v4111_v4 }
  0xce   : > { %v611_v26 = vsel %vm598_vm3, %v609_v19, %v610_v21  ;;  %v613_v11 = vsel %vm598_vm3, %v610_v21, %v612_v10  ;;  %v526_v9 = vrot.slane %v4659_v35, 1  ;;  %v615_v27 = vrot.slane %v4659_v35, 2 }
  0xcf   : > { %v4714_v28 = vsel %vm428_vm2, %v445_v22, 0.0  ;;  %v4717_v30 = vsel %vm428_vm2, %v444_v23, %v445_v22  ;;  %v4720_v31 = vsel %vm428_vm2, 0.0, %v444_v23  ;;  %4140 = vrot.lane.b32.xlu0 %v4139_v20, %s4445_s13  ;;  %v4144_v19 = vpack.i.bf16 %v613_v11, %v611_v26 }
  0xd0   : > { %v538_v5 = vrot.slane %v4714_v28, 1  ;;  %v627_v10 = vrot.slane %v4714_v28, 2  ;;  %v535_v32 = vrot.slane %v4720_v31, 1  ;;  %v624_v39 = vrot.slane %v4720_v31, 2 }
  0xd1   : > { %4145 = vrot.lane.b32.xlu1 %v4144_v19, %s4444_s21  ;;  %v392_v41 = vsel %vm378_vm0, 0.0, %v4113_v24  ;;  %v391_v42 = vsel %vm378_vm0, 0.0, %v4112_v25  ;;  %v527_v43 = vsel %vm509_vm4, %v525_v37, %v526_v9  ;;  %v529_v44 = vsel %vm509_vm4, %v526_v9, %v528_v33 }
  0xd2   : > { %v409_v45 = vsel %vm395_vm1, %v392_v41, 0.0  ;;  %v408_v46 = vsel %vm395_vm1, %v391_v42, 0.0  ;;  %v4149_v47 = vpack.i.bf16 %v529_v44, %v527_v43  ;;  %v616_v48 = vsel %vm598_vm3, %v614_v38, %v615_v27 }
  0xd3   : > { %v448_v49 = vrot.slane %v409_v45, 7  ;;  %v447_v50 = vrot.slane %v408_v46, 7  ;;  %v618_v51 = vsel %vm598_vm3, %v615_v27, %v617_v34  ;;  %v4118_v37 = vunpack.i.h.bf16 %v4116_v40  ;;  %v735_v45 = vld [vmem:[%s5897_s1 + $0x30] sm:$0x77] }
  0xd4   : > { %4150 = vrot.lane.b32.xlu0 %v4149_v47, %s4445_s13  ;;  %v4154_v52 = vpack.i.bf16 %v618_v51, %v616_v48  ;;  %v4117_v33 = vunpack.i.l.bf16 %v4116_v40  ;;  %v531_v55 = vrot.slane %v4683_v61, 1  ;;  %v620_v56 = vrot.slane %v4683_v61, 2 }
  0xd5   : > { %v491_v57 = vsel %vm428_vm2, %v448_v49, 0.0  ;;  %v4749_v58 = vsel %vm428_vm2, %v447_v50, %v448_v49  ;;  %v4752_v38 = vsel %vm428_vm2, 0.0, %v447_v50  ;;  %v394_v29 = vsel %vm378_vm0, 0.0, %v4118_v37 }
  0xd6   : > { %v543_v34 = vrot.slane %v491_v57, 1  ;;  %v632_v59 = vrot.slane %v491_v57, 2  ;;  %v540_v63 = vrot.slane %v4752_v38, 1  ;;  %v629_v4 = vrot.slane %v4752_v38, 2  ;;  %4155 = vrot.lane.b32.xlu1 %v4154_v52, %s4444_s21 }
  0xd7   : > { %v411_v8 = vsel %vm395_vm1, %v394_v29, 0.0  ;;  %v393_v12 = vsel %vm378_vm0, 0.0, %v4117_v33  ;;  %v532_v13 = vsel %vm509_vm4, %v530_v2, %v531_v55  ;;  %v534_v16 = vsel %vm509_vm4, %v531_v55, %v533_v0 }
  0xd8   : > { %v451_v17 = vrot.slane %v411_v8, 7  ;;  %v410_v18 = vsel %vm395_vm1, %v393_v12, 0.0  ;;  %v4159_v20 = vpack.i.bf16 %v534_v16, %v532_v13  ;;  %v621_v21 = vsel %vm598_vm3, %v619_v3, %v620_v56 }
  0xd9   : > { %v450_v22 = vrot.slane %v410_v18, 7  ;;  %v623_v23 = vsel %vm598_vm3, %v620_v56, %v622_v1  ;;  %v536_v24 = vrot.slane %v4717_v30, 1  ;;  %v625_v2 = vrot.slane %v4717_v30, 2 }
  0xda   : > { %v492_v25 = vsel %vm428_vm2, %v451_v17, 0.0  ;;  %4160 = vrot.lane.b32.xlu0 %v4159_v20, %s4445_s13  ;;  %v4164_v0 = vpack.i.bf16 %v623_v23, %v621_v21  ;;  %v541_v26 = vrot.slane %v4749_v58, 1  ;;  %v630_v11 = vrot.slane %v4749_v58, 2 }
  0xdb   : > { %v548_v9 = vrot.slane %v492_v25, 1  ;;  %v637_v3 = vrot.slane %v492_v25, 2  ;;  %v4778_v27 = vsel %vm428_vm2, %v450_v22, %v451_v17  ;;  %v4781_v60 = vsel %vm428_vm2, 0.0, %v450_v22 }
  0xdc   : > { %v545_v1 = vrot.slane %v4781_v60, 1  ;;  %v634_v28 = vrot.slane %v4781_v60, 2  ;;  %4165 = vrot.lane.b32.xlu1 %v4164_v0, %s4444_s21  ;;  %v537_v19 = vsel %vm509_vm4, %v535_v32, %v536_v24  ;;  %v539_v40 = vsel %vm509_vm4, %v536_v24, %v538_v5 }
  0xdd   : > { %v4169_v41 = vpack.i.bf16 %v539_v40, %v537_v19  ;;  %v626_v42 = vsel %vm598_vm3, %v624_v39, %v625_v2  ;;  %v628_v43 = vsel %vm598_vm3, %v625_v2, %v627_v10  ;;  %v542_v44 = vsel %vm509_vm4, %v540_v63, %v541_v26 }
  0xde   : > { %v4174_v46 = vpack.i.bf16 %v628_v43, %v626_v42  ;;  %v544_v47 = vsel %vm509_vm4, %v541_v26, %v543_v34  ;;  %v631_v48 = vsel %vm598_vm3, %v629_v4, %v630_v11  ;;  %v633_v32 = vsel %vm598_vm3, %v630_v11, %v632_v59 }
  0xdf   : > { %4170 = vrot.lane.b32.xlu0 %v4169_v41, %s4445_s13  ;;  %v4179_v5 = vpack.i.bf16 %v544_v47, %v542_v44  ;;  %v546_v39 = vrot.slane %v4778_v27, 1  ;;  %v635_v10 = vrot.slane %v4778_v27, 2  ;;  %v4184_v49 = vpack.i.bf16 %v633_v32, %v631_v48 }
  0xe0   : > { %4175 = vrot.lane.b32.xlu1 %v4174_v46, %s4444_s21  ;;  %v3768_v50 = vcombine.high %v735_v45, %v735_v45  ;;  %v3767_v51 = vcombine.low %v735_v45, %v735_v45  ;;  %v5907_v34 = vmov 0   ;;  %vm2110_vm0 = vcmask 130048  }
  0xe1   : > { %v547_v37 = vsel %vm509_vm4, %v545_v1, %v546_v39  ;;  %v549_v52 = vsel %vm509_vm4, %v546_v39, %v548_v9  ;;  %v636_v33 = vsel %vm598_vm3, %v634_v28, %v635_v10  ;;  %v638_v55 = vsel %vm598_vm3, %v635_v10, %v637_v3  ;;  %835 = vmatprep.mubr.bf16.mxu0 %v5907_v34 }
  0xe2   : > { %3769 = vmatprep.subr.msk.bf16.mxu0 %vm796_vm5, %v3768_v50  ;;  %v798_v56 = vsel %vm796_vm5, %v3767_v51, 0  ;;  %v4189_v57 = vpack.i.bf16 %v549_v52, %v547_v37  ;;  %v4194_v29 = vpack.i.bf16 %v638_v55, %v636_v33  ;;  %vm2319_vm1 = vcmask 261120  }
  0xe3   : > { %4180 = vrot.lane.b32.xlu0 %v4179_v5, %s4445_s13  ;;  %810 = vmatpush1.bf16.msra.mxu0 %v798_v56  ;;  %vm2424_vm5 = vcmask 523264  }
  0xe4   : > { %4185 = vrot.lane.b32.xlu1 %v4184_v49, %s4444_s21  ;;  %2799 = vmatprep.subr.bf16.mxu0 %v5907_v34 }
  0xe7   : > { %4190 = vrot.lane.b32.xlu0 %v4189_v57, %s4445_s13 }
  0xe8   : > { %4195 = vrot.lane.b32.xlu1 %v4194_v29, %s4444_s21 }
 0x138   : > { %v4126_v59 = vpop.permute.xlu1 %4125 }
 0x139   : > { %v4128_v63 = vunpack.i.h.bf16 %v4126_v59  ;;  %v4127_v4 = vunpack.i.l.bf16 %v4126_v59  ;;  %v4121_v8 = vpop.permute.xlu0 %4120 }
 0x13a   : > { %v4123_v12 = vunpack.i.h.bf16 %v4121_v8  ;;  %v4122_v13 = vunpack.i.l.bf16 %v4121_v8 }
 0x13c   : > { %v689_v16 = vsel %vm687_vm6, %v4610_v53, %v4123_v12  ;;  %v688_v17 = vsel %vm687_vm6, %v4613_v54, %v4122_v13 }
 0x13d   : > { %v4131_v18 = vpop.permute.xlu0 %4130  ;;  %v4136_v20 = vpop.permute.xlu1 %4135  ;;  %v705_v21 = vsel %vm704_vm7, %v688_v17, %v4127_v4  ;;  %v706_v22 = vsel %vm704_vm7, %v689_v16, %v4128_v63 }
 0x13e   : > { %v4133_v23 = vunpack.i.h.bf16 %v4131_v18  ;;  %v4132_v24 = vunpack.i.l.bf16 %v4131_v18  ;;  %v721_v2 = vpack.c.bf16 %v706_v22, %v705_v21  ;;  %v4138_v25 = vunpack.i.h.bf16 %v4136_v20 }
 0x13f   : > { %v4137_v0 = vunpack.i.l.bf16 %v4136_v20 }
 0x140   : > { %v691_v26 = vsel %vm687_vm6, %v4637_v14, %v4133_v23  ;;  %v690_v53 = vsel %vm687_vm6, %v4640_v15, %v4132_v24  ;;  %3770 = vmatmul.mubr.msk.bf16.vlgmr.msra.gmra.mrb[0].mxu0 %vm771_vm8, %v721_v2 }
 0x141   : > { %v4141_v54 = vpop.permute.xlu0 %4140  ;;  %845 = vmatprep.mubr.bf16.mxu0 %v5907_v34  ;;  %v707_v11 = vsel %vm704_vm7, %v690_v53, %v4137_v0  ;;  %v708_v9 = vsel %vm704_vm7, %v691_v26, %v4138_v25 }
 0x142   : > { %v4143_v3 = vunpack.i.h.bf16 %v4141_v54  ;;  %v4142_v1 = vunpack.i.l.bf16 %v4141_v54  ;;  %v722_v19 = vpack.c.bf16 %v708_v9, %v707_v11 }
 0x143   : > { %v4146_v28 = vpop.permute.xlu1 %4145 }
 0x144   : > { %v4148_v40 = vunpack.i.h.bf16 %v4146_v28  ;;  %v4147_v41 = vunpack.i.l.bf16 %v4146_v28  ;;  %v693_v14 = vsel %vm687_vm6, %v4627_v6, %v4143_v3  ;;  %v692_v15 = vsel %vm687_vm6, %v4630_v7, %v4142_v1 }
 0x146   : > { %v4151_v42 = vpop.permute.xlu0 %4150  ;;  %v709_v43 = vsel %vm704_vm7, %v692_v15, %v4147_v41  ;;  %v710_v44 = vsel %vm704_vm7, %v693_v14, %v4148_v40  ;;  %v4447_v41 = vmov 1983009808   ;;  %v952_v15 = vlaneseq }
 0x147   : > { %v4153_v45 = vunpack.i.h.bf16 %v4151_v42  ;;  %v4152_v46 = vunpack.i.l.bf16 %v4151_v42  ;;  %v723_v48 = vpack.c.bf16 %v710_v44, %v709_v43  ;;  %v950_v14 = vunpack.c.l.s4 %v4447_v41 }
 0x148   : > { %3771 = vmatmul.mubr.msk.bf16.gmra.mrb[4].mxu0 %vm771_vm8, %v722_v19  ;;  %v4156_v47 = vpop.permute.xlu1 %4155  ;;  %v953_v43 = vshrl.u32 %v952_v15, 7 }
 0x149   : > { %855 = vmatprep.mubr.bf16.mxu0 %v5907_v34  ;;  %v4158_v32 = vunpack.i.h.bf16 %v4156_v47  ;;  %v4157_v5 = vunpack.i.l.bf16 %v4156_v47  ;;  %v695_v6 = vsel %vm687_vm6, %v4659_v35, %v4153_v45  ;;  %v694_v7 = vsel %vm687_vm6, %v4662_v36, %v4152_v46 }
 0x14a   : > { %v951_v42 = vunpack.c.0.s8 %v950_v14 }
 0x14b   : > { %v711_v10 = vsel %vm704_vm7, %v694_v7, %v4157_v5  ;;  %v712_v49 = vsel %vm704_vm7, %v695_v6, %v4158_v32 }
 0x14c   : > { %v4161_v39 = vpop.permute.xlu0 %4160  ;;  %v724_v52 = vpack.c.bf16 %v712_v49, %v711_v10 }
 0x14d   : > { %v4163_v50 = vunpack.i.h.bf16 %v4161_v39  ;;  %v4162_v51 = vunpack.i.l.bf16 %v4161_v39 }
 0x14e   : > { %v4166_v37 = vpop.permute.xlu1 %4165 }
 0x14f   : > { %v4168_v33 = vunpack.i.h.bf16 %v4166_v37  ;;  %v4167_v55 = vunpack.i.l.bf16 %v4166_v37  ;;  %v697_v35 = vsel %vm687_vm6, %v4683_v61, %v4163_v50  ;;  %v696_v36 = vsel %vm687_vm6, %v4686_v62, %v4162_v51 }
 0x150   : > { %3772 = vmatmul.mubr.msk.bf16.gmra.mrb[8].mxu0 %vm771_vm8, %v723_v48 }
 0x151   : > { %865 = vmatprep.mubr.bf16.mxu0 %v5907_v34  ;;  %v4171_v56 = vpop.permute.xlu0 %4170  ;;  %v713_v57 = vsel %vm704_vm7, %v696_v36, %v4167_v55  ;;  %v714_v29 = vsel %vm704_vm7, %v697_v35, %v4168_v33  ;;  %v4901_v36 = vsub.s32 0, %v953_v43 }
 0x152   : > { %v4173_v59 = vunpack.i.h.bf16 %v4171_v56  ;;  %v4172_v63 = vunpack.i.l.bf16 %v4171_v56  ;;  %v4176_v4 = vpop.permute.xlu1 %4175  ;;  %v725_v8 = vpack.c.bf16 %v714_v29, %v713_v57 }
 0x153   : > { %v4178_v12 = vunpack.i.h.bf16 %v4176_v4  ;;  %v4177_v13 = vunpack.i.l.bf16 %v4176_v4 }
 0x154   : > { %v699_v61 = vsel %vm687_vm6, %v4717_v30, %v4173_v59  ;;  %v698_v62 = vsel %vm687_vm6, %v4720_v31, %v4172_v63 }
 0x155   : > { %v4181_v16 = vpop.permute.xlu0 %4180  ;;  %v715_v17 = vsel %vm704_vm7, %v698_v62, %v4177_v13  ;;  %v716_v18 = vsel %vm704_vm7, %v699_v61, %v4178_v12 }
 0x156   : > { %v4183_v20 = vunpack.i.h.bf16 %v4181_v16  ;;  %v4182_v21 = vunpack.i.l.bf16 %v4181_v16  ;;  %v4186_v22 = vpop.permute.xlu1 %4185  ;;  %v726_v23 = vpack.c.bf16 %v716_v18, %v715_v17 }
 0x157   : > { %v4188_v24 = vunpack.i.h.bf16 %v4186_v22  ;;  %v4187_v2 = vunpack.i.l.bf16 %v4186_v22 }
 0x158   : > { %3773 = vmatmul.mubr.msk.bf16.gmra.mrb[12].mxu0 %vm771_vm8, %v724_v52  ;;  %v701_v30 = vsel %vm687_vm6, %v4749_v58, %v4183_v20  ;;  %v700_v31 = vsel %vm687_vm6, %v4752_v38, %v4182_v21 }
 0x159   : > { %875 = vmatprep.mubr.bf16.mxu0 %v5907_v34  ;;  %v4191_v25 = vpop.permute.xlu0 %4190  ;;  %v717_v0 = vsel %vm704_vm7, %v700_v31, %v4187_v2  ;;  %v718_v26 = vsel %vm704_vm7, %v701_v30, %v4188_v24 }
 0x15a   : > { %v4193_v53 = vunpack.i.h.bf16 %v4191_v25  ;;  %v4192_v54 = vunpack.i.l.bf16 %v4191_v25  ;;  %v4196_v11 = vpop.permute.xlu1 %4195  ;;  %v727_v9 = vpack.c.bf16 %v718_v26, %v717_v0 }
 0x15b   : > { %v4198_v3 = vunpack.i.h.bf16 %v4196_v11  ;;  %v4197_v1 = vunpack.i.l.bf16 %v4196_v11 }
 0x15c   : > { %v703_v58 = vsel %vm687_vm6, %v4778_v27, %v4193_v53  ;;  %v702_v38 = vsel %vm687_vm6, %v4781_v60, %v4192_v54  ;;  %v3842_v27 = vld [vmem:[%s5898_s2] ss:$0 sm:$0xff]  ;;  %v4877_v60 = vsub.s32 %v951_v42, %v953_v43  ;;  %vm4453_vm6 = vmmov 0  }
 0x15d   : > { %v719_v28 = vsel %vm704_vm7, %v702_v38, %v4197_v1  ;;  %v720_v19 = vsel %vm704_vm7, %v703_v58, %v4198_v3  ;;  %v1546_v45 = vcombine.high %v3842_v27, %v3842_v27 }
 0x15e   : > { %v728_v40 = vpack.c.bf16 %v720_v19, %v719_v28  ;;  %v4880_v44 = vrot.slane %v3842_v27, %v4877_v60 }
 0x15f   : > { %v4887_v32 = vrot.slane %v1546_v45, %v4877_v60 }
 0x160   : > { %3774 = vmatmul.mubr.msk.bf16.gmra.mrb[16].mxu0 %vm771_vm8, %v725_v8  ;;  %v4884_v48 = vcombine.high %v4880_v44, %v4880_v44  ;;  %v4891_v50 = vrot.slane %v4880_v44, 1 }
 0x161   : > { %885 = vmatprep.mubr.bf16.mxu0 %v5907_v34  ;;  %v4898_v37 = vcombine.high %v4887_v32, %v4887_v32  ;;  %v4905_v57 = vrot.slane %v4887_v32, 1 }
 0x162   : > { %v4894_v51 = vrot.slane %v4884_v48, 1 }
 0x163   : > { %v4909_v16 = vrot.slane %v4898_v37, 1 }
 0x168   : > { %3775 = vmatmul.mubr.msk.bf16.gmra.mrb[20].mxu0 %vm771_vm8, %v726_v23 }
 0x169   : > { %895 = vmatprep.mubr.bf16.mxu0 %v5907_v34 }
 0x170   : > { %3776 = vmatmul.mubr.msk.bf16.gmra.mrb[24].mxu0 %vm771_vm8, %v727_v9 }
 0x171   : > { %905 = vmatprep.mubr.bf16.mxu0 %v5907_v34 }
 0x178   : > { %3777 = vmatmul.mubr.msk.bf16.gmra.mrb[28].mxu0 %vm771_vm8, %v728_v40 }
 0x213   : > { %v837_v46 = vpop.f32.mrb[0].mxu0 }
 0x214   : > { %v839_v47 = vpop.f32.mrb[1].mxu0 }
 0x215   : > { %v916_v5 = vmax.f32 %v837_v46, %v839_v47  ;;  %v841_v6 = vpop.f32.mrb[2].mxu0 }
 0x216   : > { %v843_v7 = vpop.f32.mrb[3].mxu0 }
 0x217   : > { %v948_v39 = vcombine.high %v916_v5, %v916_v5  ;;  %v955_v10 = vrot.slane %v916_v5, %v4877_v60  ;;  %v917_v49 = vmax.f32 %v841_v6, %v843_v7 }
 0x219   : > { %v962_v52 = vrot.slane %v948_v39, %v4877_v60  ;;  %v963_v33 = vcombine.high %v955_v10, %v955_v10  ;;  %v3778_v55 = vrot.slane %v955_v10, 9  ;;  %v965_v35 = vcombine.high %v917_v49, %v917_v49 }
 0x21a   : > { %v972_v56 = vrot.slane %v917_v49, %v4877_v60 }
 0x21b   : > { %v964_v29 = vcombine.high %v962_v52, %v962_v52  ;;  %v3779_v59 = vrot.slane %v963_v33, 9  ;;  %v3780_v63 = vrot.slane %v962_v52, 9  ;;  %v1476_v4 = vmax.f32 %v955_v10, %v3778_v55  ;;  %v847_v8 = vpop.f32.mrb[4].mxu0 }
 0x21c   : > { %v979_v12 = vrot.slane %v965_v35, %v4877_v60  ;;  %v980_v13 = vcombine.high %v972_v56, %v972_v56  ;;  %v3782_v61 = vrot.slane %v972_v56, 9  ;;  %v849_v62 = vpop.f32.mrb[5].mxu0 }
 0x21d   : > { %v3781_v17 = vrot.slane %v964_v29, 9  ;;  %v1477_v18 = vmax.f32 %v963_v33, %v3779_v59  ;;  %v1478_v20 = vmax.f32 %v962_v52, %v3780_v63  ;;  %v1575_v21 = vadd.f32 %v4880_v44, %v1476_v4  ;;  %v851_v22 = vpop.f32.mrb[6].mxu0 }
 0x21e   : > { %v981_v23 = vcombine.high %v979_v12, %v979_v12  ;;  %v3783_v24 = vrot.slane %v980_v13, 9  ;;  %v3784_v2 = vrot.slane %v979_v12, 9  ;;  %v1480_v30 = vmax.f32 %v972_v56, %v3782_v61  ;;  %v853_v31 = vpop.f32.mrb[7].mxu0 }
 0x21f   : > { %v1479_v25 = vmax.f32 %v964_v29, %v3781_v17  ;;  %v1576_v0 = vadd.f32 %v4891_v50, %v1477_v18  ;;  %v1577_v26 = vadd.f32 %v4884_v48, %v1478_v20  ;;  %v1639_v53 = vmax.f32 %v1575_v21, 0.0 }
 0x220   : > { %v3785_v54 = vrot.slane %v981_v23, 9  ;;  %v1481_v11 = vmax.f32 %v980_v13, %v3783_v24  ;;  %v1482_v9 = vmax.f32 %v979_v12, %v3784_v2  ;;  %v1579_v3 = vadd.f32 %v4887_v32, %v1480_v30 }
 0x221   : > { %v1578_v1 = vadd.f32 %v4894_v51, %v1479_v25  ;;  %v1640_v58 = vmax.f32 %v1576_v0, 0.0  ;;  %v1641_v38 = vmax.f32 %v1577_v26, 0.0  ;;  %v1770_v28 = vrot.slane %v1639_v53, %v4901_v36 }
 0x222   : > { %v4917_v19 = vmax.f32 %v981_v23, %v3785_v54  ;;  %v1580_v40 = vadd.f32 %v4905_v57, %v1481_v11  ;;  %v4921_v41 = vadd.f32 %v4898_v37, %v1482_v9  ;;  %v1643_v14 = vmax.f32 %v1579_v3, 0.0 }
 0x223   : > { %v1642_v15 = vmax.f32 %v1578_v1, 0.0  ;;  %v1774_v42 = vrot.slane %v1640_v58, %v4901_v36  ;;  %v4925_v43 = vrot.slane %v1641_v38, %v4901_v36  ;;  %v918_v27 = vmax.f32 %v847_v8, %v849_v62  ;;  %v857_v45 = vpop.f32.mrb[8].mxu0 }
 0x224   : > { %v1644_v46 = vmax.f32 %v1580_v40, 0.0  ;;  %v4929_v5 = vrot.slane %v1643_v14, %v4901_v36  ;;  %v919_v6 = vmax.f32 %v851_v22, %v853_v31  ;;  %v859_v7 = vpop.f32.mrb[9].mxu0 }
 0x225   : > { %v4932_v39 = vrot.slane %v1642_v15, %v4901_v36  ;;  %v4935_v10 = vsel %vm2023_vm9, %v1774_v42, %v1770_v28  ;;  %v982_v49 = vcombine.high %v918_v27, %v918_v27  ;;  %v989_v52 = vrot.slane %v918_v27, %v4877_v60  ;;  %v861_v33 = vpop.f32.mrb[10].mxu0 }
 0x226   : > { %v4939_v55 = vrot.slane %v1644_v46, %v4901_v36  ;;  %v999_v35 = vcombine.high %v919_v6, %v919_v6  ;;  %v1006_v56 = vrot.slane %v919_v6, %v4877_v60  ;;  %v920_v29 = vmax.f32 %v857_v45, %v859_v7  ;;  %v863_v59 = vpop.f32.mrb[11].mxu0 }
 0x227   : > { %v996_v63 = vrot.slane %v982_v49, %v4877_v60  ;;  %v997_v4 = vcombine.high %v989_v52, %v989_v52  ;;  %v3786_v8 = vrot.slane %v989_v52, 9  ;;  %v921_v12 = vmax.f32 %v861_v33, %v863_v59 }
 0x228   : > { %v1013_v13 = vrot.slane %v999_v35, %v4877_v60  ;;  %v1014_v61 = vcombine.high %v1006_v56, %v1006_v56  ;;  %v3790_v62 = vrot.slane %v1006_v56, 9  ;;  %v1016_v17 = vcombine.high %v920_v29, %v920_v29 }
 0x229   : > { %v998_v18 = vcombine.high %v996_v63, %v996_v63  ;;  %v3787_v20 = vrot.slane %v997_v4, 9  ;;  %v3788_v21 = vrot.slane %v996_v63, 9  ;;  %v1484_v22 = vmax.f32 %v989_v52, %v3786_v8 }
 0x22a   : > { %v1015_v23 = vcombine.high %v1013_v13, %v1013_v13  ;;  %v3791_v24 = vrot.slane %v1014_v61, 9  ;;  %v3792_v2 = vrot.slane %v1013_v13, 9  ;;  %v1488_v30 = vmax.f32 %v1006_v56, %v3790_v62 }
 0x22b   : > { %v3789_v31 = vrot.slane %v998_v18, 9  ;;  %v1485_v25 = vmax.f32 %v997_v4, %v3787_v20  ;;  %v1486_v0 = vmax.f32 %v996_v63, %v3788_v21  ;;  %v1583_v26 = vadd.f32 %v4880_v44, %v1484_v22  ;;  %v867_v53 = vpop.f32.mrb[12].mxu0 }
 0x22c   : > { %v3793_v54 = vrot.slane %v1015_v23, 9  ;;  %v1489_v11 = vmax.f32 %v1014_v61, %v3791_v24  ;;  %v1490_v9 = vmax.f32 %v1013_v13, %v3792_v2  ;;  %v1587_v3 = vadd.f32 %v4887_v32, %v1488_v30  ;;  %v869_v1 = vpop.f32.mrb[13].mxu0 }
 0x22d   : > { %v1487_v58 = vmax.f32 %v998_v18, %v3789_v31  ;;  %v1584_v38 = vadd.f32 %v4891_v50, %v1485_v25  ;;  %v1585_v28 = vadd.f32 %v4884_v48, %v1486_v0  ;;  %v1647_v40 = vmax.f32 %v1583_v26, 0.0  ;;  %v871_v14 = vpop.f32.mrb[14].mxu0 }
 0x22e   : > { %v4948_v15 = vmax.f32 %v1015_v23, %v3793_v54  ;;  %v1588_v42 = vadd.f32 %v4905_v57, %v1489_v11  ;;  %v4952_v27 = vadd.f32 %v4898_v37, %v1490_v9  ;;  %v1651_v45 = vmax.f32 %v1587_v3, 0.0  ;;  %v873_v46 = vpop.f32.mrb[15].mxu0 }
 0x22f   : > { %v1586_v6 = vadd.f32 %v4894_v51, %v1487_v58  ;;  %v1648_v7 = vmax.f32 %v1584_v38, 0.0  ;;  %v1649_v49 = vmax.f32 %v1585_v28, 0.0  ;;  %v1802_v52 = vrot.slane %v1647_v40, %v4901_v36 }
 0x230   : > { %v1652_v33 = vmax.f32 %v1588_v42, 0.0  ;;  %v4958_v56 = vrot.slane %v1651_v45, %v4901_v36  ;;  %v1023_v59 = vrot.slane %v920_v29, %v4877_v60  ;;  %v1030_v13 = vrot.slane %v1016_v17, %v4877_v60 }
 0x231   : > { %v1650_v63 = vmax.f32 %v1586_v6, 0.0  ;;  %v1806_v4 = vrot.slane %v1648_v7, %v4901_v36  ;;  %v4963_v8 = vrot.slane %v1649_v49, %v4901_v36  ;;  %v1033_v20 = vcombine.high %v921_v12, %v921_v12 }
 0x232   : > { %v4967_v61 = vrot.slane %v1652_v33, %v4901_v36  ;;  %v1031_v62 = vcombine.high %v1023_v59, %v1023_v59  ;;  %v3794_v18 = vrot.slane %v1023_v59, 9  ;;  %v1032_v29 = vcombine.high %v1030_v13, %v1030_v13 }
 0x233   : > { %v4970_v21 = vrot.slane %v1650_v63, %v4901_v36  ;;  %v4973_v22 = vsel %vm2023_vm9, %v1806_v4, %v1802_v52  ;;  %v3796_v23 = vrot.slane %v1030_v13, 9  ;;  %v4975_v24 = vpop.f32.mrb[16].mxu0  ;;  %v1040_v17 = vrot.slane %v921_v12, %v4877_v60 }
 0x234   : > { %v3795_v2 = vrot.slane %v1031_v62, 9  ;;  %v1492_v30 = vmax.f32 %v1023_v59, %v3794_v18  ;;  %v1047_v31 = vrot.slane %v1033_v20, %v4877_v60  ;;  %v4979_v25 = vpop.f32.mrb[17].mxu0  ;;  %v3797_v0 = vrot.slane %v1032_v29, 9 }
 0x235   : > { %v1494_v26 = vmax.f32 %v1030_v13, %v3796_v23  ;;  %v922_v54 = vmax.f32 %v867_v53, %v869_v1  ;;  %v923_v11 = vmax.f32 %v871_v14, %v873_v46  ;;  %v4981_v9 = vpop.f32.mrb[18].mxu0  ;;  %v1048_v38 = vcombine.high %v1040_v17, %v1040_v17 }
 0x236   : > { %v1493_v3 = vmax.f32 %v1031_v62, %v3795_v2  ;;  %v1591_v58 = vadd.f32 %v4880_v44, %v1492_v30  ;;  %v1049_v28 = vcombine.high %v1047_v31, %v1047_v31  ;;  %v4984_v40 = vpop.f32.mrb[19].mxu0  ;;  %v1495_v42 = vmax.f32 %v1032_v29, %v3797_v0 }
 0x237   : > { %v1593_v12 = vadd.f32 %v4884_v48, %v1494_v26  ;;  %v3798_v45 = vrot.slane %v1040_v17, 9  ;;  %v3800_v6 = vrot.slane %v1047_v31, 9  ;;  %v3799_v52 = vrot.slane %v1048_v38, 9 }
 0x238   : > { %v1592_v7 = vadd.f32 %v4891_v50, %v1493_v3  ;;  %v1655_v49 = vmax.f32 %v1591_v58, 0.0  ;;  %v3801_v53 = vrot.slane %v1049_v28, 9  ;;  %v1594_v1 = vadd.f32 %v4894_v51, %v1495_v42 }
 0x239   : > { %v1657_v14 = vmax.f32 %v1593_v12, 0.0  ;;  %v1496_v46 = vmax.f32 %v1040_v17, %v3798_v45  ;;  %v1498_v33 = vmax.f32 %v1047_v31, %v3800_v6  ;;  %v1497_v4 = vmax.f32 %v1048_v38, %v3799_v52 }
 0x23a   : > { %v1656_v59 = vmax.f32 %v1592_v7, 0.0  ;;  %v1834_v63 = vrot.slane %v1655_v49, %v4901_v36  ;;  %v4990_v13 = vmax.f32 %v1049_v28, %v3801_v53  ;;  %v1658_v62 = vmax.f32 %v1594_v1, 0.0 }
 0x23b   : > { %v4993_v18 = vrot.slane %v1657_v14, %v4901_v36  ;;  %v1595_v20 = vadd.f32 %v4887_v32, %v1496_v46  ;;  %v4997_v29 = vadd.f32 %v4898_v37, %v1498_v33  ;;  %v4999_v23 = vpop.f32.mrb[20].mxu0  ;;  %v1596_v30 = vadd.f32 %v4905_v57, %v1497_v4 }
 0x23c   : > { %v1838_v2 = vrot.slane %v1656_v59, %v4901_v36  ;;  %v1050_v17 = vcombine.high %v922_v54, %v922_v54  ;;  %v1057_v31 = vrot.slane %v922_v54, %v4877_v60  ;;  %v5004_v0 = vpop.f32.mrb[21].mxu0  ;;  %v5007_v26 = vrot.slane %v1658_v62, %v4901_v36 }
 0x23d   : > { %v1659_v3 = vmax.f32 %v1595_v20, 0.0  ;;  %v1067_v38 = vcombine.high %v923_v11, %v923_v11  ;;  %v5010_v28 = vpop.f32.mrb[22].mxu0  ;;  %v1660_v12 = vmax.f32 %v1596_v30, 0.0  ;;  %v1074_v52 = vrot.slane %v923_v11, %v4877_v60 }
 0x23e   : > { %v5013_v42 = vsel %vm2023_vm9, %v1838_v2, %v1834_v63  ;;  %v1064_v45 = vrot.slane %v1050_v17, %v4877_v60  ;;  %v1065_v6 = vcombine.high %v1057_v31, %v1057_v31  ;;  %v5016_v7 = vpop.f32.mrb[23].mxu0  ;;  %v3802_v49 = vrot.slane %v1057_v31, 9 }
 0x23f   : > { %v5019_v54 = vrot.slane %v1659_v3, %v4901_v36  ;;  %v1081_v53 = vrot.slane %v1067_v38, %v4877_v60  ;;  %v5024_v1 = vrot.slane %v1660_v12, %v4901_v36  ;;  %v1082_v63 = vcombine.high %v1074_v52, %v1074_v52 }
 0x240   : > { %v1066_v14 = vcombine.high %v1064_v45, %v1064_v45  ;;  %v3803_v46 = vrot.slane %v1065_v6, 9  ;;  %v3804_v33 = vrot.slane %v1064_v45, 9  ;;  %v1500_v59 = vmax.f32 %v1057_v31, %v3802_v49 }
 0x241   : > { %5916 = vst [vmem:[#allocation8_spill] sm:$0xff] %v5024_v1  ;;  %v1083_v4 = vcombine.high %v1081_v53, %v1081_v53  ;;  %v3806_v62 = vrot.slane %v1074_v52, 9  ;;  %v3808_v17 = vrot.slane %v1081_v53, 9  ;;  %v3807_v34 = vrot.slane %v1082_v63, 9 }
 0x242   : > { %v3805_v20 = vrot.slane %v1066_v14, 9  ;;  %v1501_v2 = vmax.f32 %v1065_v6, %v3803_v46  ;;  %v1502_v30 = vmax.f32 %v1064_v45, %v3804_v33  ;;  %v1599_v3 = vadd.f32 %v4880_v44, %v1500_v59 }
 0x243   : > { %v3809_v11 = vrot.slane %v1083_v4, 9  ;;  %v1504_v58 = vmax.f32 %v1074_v52, %v3806_v62  ;;  %v5027_v38 = vpop.f32.mrb[24].mxu0  ;;  %v1506_v49 = vmax.f32 %v1081_v53, %v3808_v17  ;;  %v1505_v6 = vmax.f32 %v1082_v63, %v3807_v34 }
 0x244   : > { %v1503_v12 = vmax.f32 %v1066_v14, %v3805_v20  ;;  %v1600_v35 = vadd.f32 %v4891_v50, %v1501_v2  ;;  %v1601_v31 = vadd.f32 %v4884_v48, %v1502_v30  ;;  %v5031_v47 = vpop.f32.mrb[25].mxu0  ;;  %v1663_v1 = vmax.f32 %v1599_v3, 0.0 }
 0x245   : > { %v5033_v45 = vmax.f32 %v1083_v4, %v3809_v11  ;;  %v1603_v46 = vadd.f32 %v4887_v32, %v1504_v58  ;;  %v5036_v33 = vpop.f32.mrb[26].mxu0  ;;  %v5040_v62 = vadd.f32 %v4898_v37, %v1506_v49  ;;  %v1604_v34 = vadd.f32 %v4905_v57, %v1505_v6 }
 0x246   : > { %v1602_v52 = vadd.f32 %v4894_v51, %v1503_v12  ;;  %v1664_v59 = vmax.f32 %v1600_v35, 0.0  ;;  %v1665_v14 = vmax.f32 %v1601_v31, 0.0  ;;  %v5042_v20 = vpop.f32.mrb[27].mxu0  ;;  %v1866_v53 = vrot.slane %v1663_v1, %v4901_v36 }
 0x247   : > { %v1667_v63 = vmax.f32 %v1603_v46, 0.0  ;;  %v924_v58 = vmax.f32 %v4975_v24, %v4979_v25  ;;  %v1668_v17 = vmax.f32 %v1604_v34, 0.0  ;;  %v1582_v25 = vadd.f32 %v4909_v16, %v4917_v19 }
 0x248   : > { %v1666_v4 = vmax.f32 %v1602_v52, 0.0  ;;  %v1870_v2 = vrot.slane %v1664_v59, %v4901_v36  ;;  %v5050_v35 = vrot.slane %v1665_v14, %v4901_v36  ;;  %v1590_v31 = vadd.f32 %v4909_v16, %v4948_v15 }
 0x249   : > { %v5054_v3 = vrot.slane %v1667_v63, %v4901_v36  ;;  %v1084_v1 = vcombine.high %v924_v58, %v924_v58  ;;  %v1091_v11 = vrot.slane %v924_v58, %v4877_v60  ;;  %v5068_v49 = vrot.slane %v1668_v17, %v4901_v36 }
 0x24a   : > { %v5058_v12 = vrot.slane %v1666_v4, %v4901_v36  ;;  %v5061_v24 = vsel %vm2023_vm9, %v1870_v2, %v1866_v53  ;;  %v1646_v14 = vmax.f32 %v1582_v25, 0.0  ;;  %v1654_v53 = vmax.f32 %v1590_v31, 0.0 }
 0x24b   : > { %v1098_v6 = vrot.slane %v1084_v1, %v4877_v60  ;;  %v1099_v46 = vcombine.high %v1091_v11, %v1091_v11  ;;  %v3810_v52 = vrot.slane %v1091_v11, 9  ;;  %v5071_v59 = vpop.f32.mrb[28].mxu0  ;;  %v5918_v34 = vmax.f32 %v4921_v41, 0.0 }
 0x24c   : > { %5917 = vst [vmem:[#allocation9_spill] sm:$0xff] %v5071_v59  ;;  %v5919_v15 = vmax.f32 %v4952_v27, 0.0  ;;  %v5079_v58 = vpop.f32.mrb[29].mxu0  ;;  %v1798_v59 = vrot.slane %v1646_v14, %v4901_v36  ;;  %v1830_v25 = vrot.slane %v1654_v53, %v4901_v36  ;;  %v2026_v41 = vsel %vm2025_vm10, %v4925_v43, %v4935_v10 }
 0x24d   : > { %v1794_v19 = vrot.slane %v5918_v34, %v4901_v36  ;;  %5920 = vst [vmem:[#allocation10_spill] sm:$0xff] %v5079_v58  ;;  %v1100_v4 = vcombine.high %v1098_v6, %v1098_v6  ;;  %v3811_v2 = vrot.slane %v1099_v46, 9  ;;  %v3812_v17 = vrot.slane %v1098_v6, 9  ;;  %v5081_v30 = vpop.f32.mrb[30].mxu0 }
 0x24e   : > { %v1826_v63 = vrot.slane %v5919_v15, %v4901_v36  ;;  %v1508_v1 = vmax.f32 %v1091_v11, %v3810_v52  ;;  %v2038_v27 = vsel %vm2025_vm10, %v4963_v8, %v4973_v22  ;;  %v5091_v31 = vpop.f32.mrb[31].mxu0  ;;  %v2028_v52 = vsel %vm2027_vm11, %v4932_v39, %v2026_v41 }
 0x24f   : > { %v3813_v34 = vrot.slane %v1100_v4, 9  ;;  %v1509_v15 = vmax.f32 %v1099_v46, %v3811_v2  ;;  %v1510_v58 = vmax.f32 %v1098_v6, %v3812_v17  ;;  %v2039_v14 = vsel %vm2027_vm11, %v4970_v21, %v2038_v27 }
 0x250   : > { %v1607_v11 = vadd.f32 %v4880_v44, %v1508_v1  ;;  %v925_v43 = vmax.f32 %v4981_v9, %v4984_v40  ;;  %v926_v10 = vmax.f32 %v4999_v23, %v5004_v0  ;;  %v2030_v53 = vsel %vm2029_vm12, %v4929_v5, %v2028_v52 }
 0x251   : > { %v1511_v8 = vmax.f32 %v1100_v4, %v3813_v34  ;;  %v1608_v22 = vadd.f32 %v4891_v50, %v1509_v15  ;;  %v1609_v46 = vadd.f32 %v4884_v48, %v1510_v58  ;;  %v2040_v39 = vsel %vm2029_vm12, %v4958_v56, %v2039_v14 }
 0x252   : > { %v1671_v6 = vmax.f32 %v1607_v11, 0.0  ;;  %v1101_v2 = vcombine.high %v925_v43, %v925_v43  ;;  %v1108_v21 = vrot.slane %v925_v43, %v4877_v60  ;;  %v2032_v0 = vsel %vm2031_vm13, %v4939_v55, %v2030_v53 }
 0x253   : > { %v1610_v9 = vadd.f32 %v4894_v51, %v1511_v8  ;;  %v1672_v40 = vmax.f32 %v1608_v22, 0.0  ;;  %v1673_v17 = vmax.f32 %v1609_v46, 0.0  ;;  %v2041_v58 = vsel %vm2031_vm13, %v4967_v61, %v2040_v39 }
 0x254   : > { %v1898_v23 = vrot.slane %v1671_v6, %v4901_v36  ;;  %v1115_v5 = vrot.slane %v1101_v2, %v4877_v60  ;;  %v1116_v4 = vcombine.high %v1108_v21, %v1108_v21  ;;  %v2034_v27 = vsel %vm2033_vm14, %v1794_v19, %v2032_v0 }
 0x255   : > { %v1674_v1 = vmax.f32 %v1610_v9, 0.0  ;;  %v1902_v56 = vrot.slane %v1672_v40, %v4901_v36  ;;  %v5118_v41 = vrot.slane %v1673_v17, %v4901_v36  ;;  %v2036_v34 = vsel %vm2035_vm15, %v1798_v59, %v2034_v27 }
 0x256   : > { %v2042_v15 = vsel %vm2033_vm14, %v1826_v63, %v2041_v58  ;;  %v1117_v11 = vcombine.high %v1115_v5, %v1115_v5  ;;  %v3814_v55 = vrot.slane %v1108_v21, 9  ;;  %v3815_v43 = vrot.slane %v1116_v4, 9 }
 0x257   : > { %v5124_v52 = vrot.slane %v1674_v1, %v4901_v36  ;;  %v5127_v61 = vsel %vm2023_vm9, %v1902_v56, %v1898_v23  ;;  %v2043_v14 = vsel %vm2035_vm15, %v1830_v25, %v2042_v15  ;;  %v3816_v22 = vrot.slane %v1115_v5, 9 }
 0x258   : > { %v4199_v8 = vpack.i.bf16 %v2043_v14, %v2036_v34  ;;  %v3817_v46 = vrot.slane %v1117_v11, 9  ;;  %v1512_v6 = vmax.f32 %v1108_v21, %v3814_v55  ;;  %v1513_v19 = vmax.f32 %v1116_v4, %v3815_v43 }
 0x259   : > { %v1118_v53 = vcombine.high %v926_v10, %v926_v10  ;;  %v1125_v59 = vrot.slane %v926_v10, %v4877_v60  ;;  %v927_v63 = vmax.f32 %v5010_v28, %v5016_v7  ;;  %v1514_v39 = vmax.f32 %v1115_v5, %v3816_v22 }
 0x25a   : > { %4200 = vrot.lane.b32.xlu0 %v4199_v8, %s4448_s8  ;;  %v5134_v2 = vmax.f32 %v1117_v11, %v3817_v46  ;;  %v1611_v25 = vadd.f32 %v4887_v32, %v1512_v6  ;;  %v928_v9 = vmax.f32 %v5027_v38, %v5031_v47  ;;  %v1612_v21 = vadd.f32 %v4905_v57, %v1513_v19 }
 0x25b   : > { %v1132_v40 = vrot.slane %v1118_v53, %v4877_v60  ;;  %v1133_v17 = vcombine.high %v1125_v59, %v1125_v59  ;;  %v3818_v10 = vrot.slane %v1125_v59, 9  ;;  %v5142_v23 = vadd.f32 %v4898_v37, %v1514_v39 }
 0x25c   : > { %v1675_v28 = vmax.f32 %v1611_v25, 0.0  ;;  %v1135_v7 = vcombine.high %v927_v63, %v927_v63  ;;  %v1142_v0 = vrot.slane %v927_v63, %v4877_v60  ;;  %v1676_v58 = vmax.f32 %v1612_v21, 0.0 }
 0x25d   : > { %v1134_v5 = vcombine.high %v1132_v40, %v1132_v40  ;;  %v3819_v4 = vrot.slane %v1133_v17, 9  ;;  %v3820_v1 = vrot.slane %v1132_v40, 9  ;;  %v1677_v56 = vmax.f32 %v5142_v23, 0.0 }
 0x25e   : > { %v5147_v47 = vrot.slane %v1675_v28, %v4901_v36  ;;  %v1516_v38 = vmax.f32 %v1125_v59, %v3818_v10  ;;  %v1149_v27 = vrot.slane %v1135_v7, %v4877_v60  ;;  %v5151_v34 = vrot.slane %v1676_v58, %v4901_v36 }
 0x25f   : > { %v3821_v15 = vrot.slane %v1134_v5, 9  ;;  %v1517_v11 = vmax.f32 %v1133_v17, %v3819_v4  ;;  %v1518_v55 = vmax.f32 %v1132_v40, %v3820_v1  ;;  %v1150_v43 = vcombine.high %v1142_v0, %v1142_v0 }
 0x260   : > { %v1615_v14 = vadd.f32 %v4880_v44, %v1516_v38  ;;  %v1151_v8 = vcombine.high %v1149_v27, %v1149_v27  ;;  %v3822_v22 = vrot.slane %v1142_v0, 9  ;;  %v3824_v53 = vrot.slane %v1149_v27, 9 }
 0x261   : > { %v1519_v46 = vmax.f32 %v1134_v5, %v3821_v15  ;;  %v1616_v6 = vadd.f32 %v4891_v50, %v1517_v11  ;;  %v1617_v19 = vadd.f32 %v4884_v48, %v1518_v55  ;;  %v3823_v63 = vrot.slane %v1150_v43, 9 }
 0x262   : > { %v1679_v59 = vmax.f32 %v1615_v14, 0.0  ;;  %v3825_v39 = vrot.slane %v1151_v8, 9  ;;  %v1520_v25 = vmax.f32 %v1142_v0, %v3822_v22  ;;  %v1522_v40 = vmax.f32 %v1149_v27, %v3824_v53 }
 0x263   : > { %v1618_v21 = vadd.f32 %v4894_v51, %v1519_v46  ;;  %v1680_v10 = vmax.f32 %v1616_v6, 0.0  ;;  %v1681_v17 = vmax.f32 %v1617_v19, 0.0  ;;  %v1521_v7 = vmax.f32 %v1150_v43, %v3823_v63 }
 0x264   : > { %v1930_v28 = vrot.slane %v1679_v59, %v4901_v36  ;;  %v5158_v58 = vmax.f32 %v1151_v8, %v3825_v39  ;;  %v1619_v5 = vadd.f32 %v4887_v32, %v1520_v25  ;;  %v5166_v0 = vadd.f32 %v4898_v37, %v1522_v40 }
 0x265   : > { %v1682_v4 = vmax.f32 %v1618_v21, 0.0  ;;  %v1934_v1 = vrot.slane %v1680_v10, %v4901_v36  ;;  %v5163_v38 = vrot.slane %v1681_v17, %v4901_v36  ;;  %v1620_v15 = vadd.f32 %v4905_v57, %v1521_v7 }
 0x266   : > { %v1683_v11 = vmax.f32 %v1619_v5, 0.0  ;;  %v1152_v27 = vcombine.high %v928_v9, %v928_v9  ;;  %v1159_v55 = vrot.slane %v928_v9, %v4877_v60  ;;  %v1685_v8 = vmax.f32 %v5166_v0, 0.0 }
 0x267   : > { %v5171_v14 = vrot.slane %v1682_v4, %v4901_v36  ;;  %v5174_v43 = vsel %vm2023_vm9, %v1934_v1, %v1930_v28  ;;  %v1598_v22 = vadd.f32 %v4909_v16, %v4990_v13  ;;  %v1684_v46 = vmax.f32 %v1620_v15, 0.0 }
 0x268   : > { %v5180_v6 = vrot.slane %v1683_v11, %v4901_v36  ;;  %v1166_v19 = vrot.slane %v1152_v27, %v4877_v60  ;;  %v1167_v53 = vcombine.high %v1159_v55, %v1159_v55  ;;  %v3826_v59 = vrot.slane %v1159_v55, 9 }
 0x269   : > { %v1606_v9 = vadd.f32 %v4909_v16, %v5033_v45  ;;  %v1662_v63 = vmax.f32 %v1598_v22, 0.0  ;;  %v5921_v39 = vmax.f32 %v4997_v29, 0.0  ;;  %v5189_v21 = vrot.slane %v1684_v46, %v4901_v36 }
 0x26a   : > { %v1168_v13 = vcombine.high %v1166_v19, %v1166_v19  ;;  %v3827_v10 = vrot.slane %v1167_v53, 9  ;;  %v3828_v17 = vrot.slane %v1166_v19, 9  ;;  %v1524_v40 = vmax.f32 %v1159_v55, %v3826_v59 }
 0x26b   : > { %v1858_v25 = vrot.slane %v5921_v39, %v4901_v36  ;;  %v1670_v28 = vmax.f32 %v1606_v9, 0.0  ;;  %v1862_v7 = vrot.slane %v1662_v63, %v4901_v36  ;;  %v5922_v5 = vmax.f32 %v5040_v62, 0.0 }
 0x26c   : > { %v3829_v45 = vrot.slane %v1168_v13, 9  ;;  %v1525_v1 = vmax.f32 %v1167_v53, %v3827_v10  ;;  %v1526_v15 = vmax.f32 %v1166_v19, %v3828_v17  ;;  %v2045_v29 = vsel %vm2025_vm10, %v4993_v18, %v5013_v42  ;;  %v5923_v42 = vld [vmem:[#allocation8_spill] sm:$0xff] }
 0x26d   : > { %v1890_v4 = vrot.slane %v5922_v5, %v4901_v36  ;;  %v1623_v11 = vadd.f32 %v4880_v44, %v1524_v40  ;;  %v1894_v27 = vrot.slane %v1670_v28, %v4901_v36  ;;  %v2046_v55 = vsel %vm2027_vm11, %v5007_v26, %v2045_v29 }
 0x26e   : > { %v2052_v22 = vsel %vm2025_vm10, %v5050_v35, %v5061_v24  ;;  %v1527_v62 = vmax.f32 %v1168_v13, %v3829_v45  ;;  %v1624_v46 = vadd.f32 %v4891_v50, %v1525_v1  ;;  %v1625_v19 = vadd.f32 %v4884_v48, %v1526_v15  ;;  %v5925_v45 = vld [vmem:[#allocation9_spill] sm:$0xff] }
 0x26f   : > { %v2047_v53 = vsel %vm2029_vm12, %v5019_v54, %v2046_v55  ;;  %v1687_v18 = vmax.f32 %v1623_v11, 0.0  ;;  %v2053_v9 = vsel %vm2027_vm11, %v5058_v12, %v2052_v22  ;;  %v929_v26 = vmax.f32 %v5036_v33, %v5042_v20 }
 0x270   : > { %v2048_v59 = vsel %vm2031_vm13, %v5923_v42, %v2047_v53  ;;  %v1626_v35 = vadd.f32 %v4894_v51, %v1527_v62  ;;  %v1688_v24 = vmax.f32 %v1624_v46, 0.0  ;;  %v1689_v63 = vmax.f32 %v1625_v19, 0.0 }
 0x271   : > { %v2049_v39 = vsel %vm2033_vm14, %v1858_v25, %v2048_v59  ;;  %v1962_v13 = vrot.slane %v1687_v18, %v4901_v36  ;;  %v2054_v10 = vsel %vm2029_vm12, %v5054_v3, %v2053_v9  ;;  %v1169_v17 = vcombine.high %v929_v26, %v929_v26 }
 0x272   : > { %v2050_v54 = vsel %vm2035_vm15, %v1862_v7, %v2049_v39  ;;  %v1690_v40 = vmax.f32 %v1626_v35, 0.0  ;;  %v1966_v12 = vrot.slane %v1688_v24, %v4901_v36  ;;  %v5223_v28 = vrot.slane %v1689_v63, %v4901_v36  ;;  %v5924_v7 = vld [vmem:[#allocation10_spill] sm:$0xff] }
 0x273   : > { %v2055_v33 = vsel %vm2031_vm13, %v5068_v49, %v2054_v10  ;;  %v1176_v25 = vrot.slane %v929_v26, %v4877_v60  ;;  %v1183_v5 = vrot.slane %v1169_v17, %v4877_v60  ;;  %v930_v1 = vmax.f32 %v5925_v45, %v5924_v7 }
 0x274   : > { %v2056_v20 = vsel %vm2033_vm14, %v1890_v4, %v2055_v33  ;;  %v5233_v3 = vrot.slane %v1690_v40, %v4901_v36  ;;  %v5236_v15 = vsel %vm2023_vm9, %v1966_v12, %v1962_v13  ;;  %v931_v49 = vmax.f32 %v5081_v30, %v5091_v31 }
 0x275   : > { %v2057_v29 = vsel %vm2035_vm15, %v1894_v27, %v2056_v20  ;;  %v1184_v4 = vcombine.high %v1176_v25, %v1176_v25  ;;  %v1185_v55 = vcombine.high %v1183_v5, %v1183_v5  ;;  %v3830_v22 = vrot.slane %v1176_v25, 9 }
 0x276   : > { %v4204_v11 = vpack.i.bf16 %v2057_v29, %v2050_v54  ;;  %v3832_v62 = vrot.slane %v1183_v5, 9  ;;  %v1186_v46 = vcombine.high %v930_v1, %v930_v1  ;;  %v1193_v19 = vrot.slane %v930_v1, %v4877_v60 }
 0x277   : > { %v1203_v53 = vcombine.high %v931_v49, %v931_v49  ;;  %v3831_v18 = vrot.slane %v1184_v4, 9  ;;  %v3833_v42 = vrot.slane %v1185_v55, 9  ;;  %v1528_v59 = vmax.f32 %v1176_v25, %v3830_v22 }
 0x278   : > { %4205 = vrot.lane.b32.xlu1 %v4204_v11, %s4448_s8  ;;  %v1210_v9 = vrot.slane %v931_v49, %v4877_v60  ;;  %v1530_v27 = vmax.f32 %v1183_v5, %v3832_v62  ;;  %v1200_v26 = vrot.slane %v1186_v46, %v4877_v60  ;;  %v1201_v30 = vcombine.high %v1193_v19, %v1193_v19 }
 0x279   : > { %v3834_v31 = vrot.slane %v1193_v19, 9  ;;  %v1529_v35 = vmax.f32 %v1184_v4, %v3831_v18  ;;  %v5245_v24 = vmax.f32 %v1185_v55, %v3833_v42  ;;  %v1627_v63 = vadd.f32 %v4887_v32, %v1528_v59 }
 0x27a   : > { %v1217_v39 = vrot.slane %v1203_v53, %v4877_v60  ;;  %v5250_v13 = vadd.f32 %v4898_v37, %v1530_v27  ;;  %v1202_v54 = vcombine.high %v1200_v26, %v1200_v26  ;;  %v3835_v10 = vrot.slane %v1201_v30, 9 }
 0x27b   : > { %v3836_v17 = vrot.slane %v1200_v26, 9  ;;  %v1628_v40 = vadd.f32 %v4905_v57, %v1529_v35  ;;  %v1691_v12 = vmax.f32 %v1627_v63, 0.0  ;;  %v1532_v33 = vmax.f32 %v1193_v19, %v3834_v31 }
 0x27c   : > { %v1218_v20 = vcombine.high %v1210_v9, %v1210_v9  ;;  %v1693_v25 = vmax.f32 %v5250_v13, 0.0  ;;  %v3837_v5 = vrot.slane %v1202_v54, 9  ;;  %v1533_v7 = vmax.f32 %v1201_v30, %v3835_v10 }
 0x27d   : > { %v1534_v45 = vmax.f32 %v1200_v26, %v3836_v17  ;;  %v1692_v1 = vmax.f32 %v1628_v40, 0.0  ;;  %v5255_v29 = vrot.slane %v1691_v12, %v4901_v36  ;;  %v1631_v49 = vadd.f32 %v4880_v44, %v1532_v33 }
 0x27e   : > { %v1219_v11 = vcombine.high %v1217_v39, %v1217_v39  ;;  %v1535_v4 = vmax.f32 %v1202_v54, %v3837_v5  ;;  %v1632_v55 = vadd.f32 %v4891_v50, %v1533_v7  ;;  %v3838_v62 = vrot.slane %v1210_v9, 9 }
 0x27f   : > { %v1633_v22 = vadd.f32 %v4884_v48, %v1534_v45  ;;  %v1982_v46 = vrot.slane %v1692_v1, %v4901_v36  ;;  %v1695_v19 = vmax.f32 %v1631_v49, 0.0  ;;  %v3839_v53 = vrot.slane %v1218_v20, 9 }
 0x280   : > { %v3840_v18 = vrot.slane %v1217_v39, 9  ;;  %v1634_v42 = vadd.f32 %v4894_v51, %v1535_v4  ;;  %v1696_v59 = vmax.f32 %v1632_v55, 0.0  ;;  %v3841_v26 = vrot.slane %v1219_v11, 9 }
 0x281   : > { %v1697_v27 = vmax.f32 %v1633_v22, 0.0  ;;  %v1994_v30 = vrot.slane %v1695_v19, %v4901_v36  ;;  %v1536_v44 = vmax.f32 %v1210_v9, %v3838_v62  ;;  %v1537_v31 = vmax.f32 %v1218_v20, %v3839_v53 }
 0x282   : > { %v1538_v35 = vmax.f32 %v1217_v39, %v3840_v18  ;;  %v1698_v63 = vmax.f32 %v1634_v42, 0.0  ;;  %v1998_v50 = vrot.slane %v1696_v59, %v4901_v36  ;;  %v1539_v13 = vmax.f32 %v1219_v11, %v3841_v26  ;;  %v4311_v26 = vld [vmem:[%s5899_s3 + $0x88] sm:$0xff]  }
 0x283   : > { %v2002_v48 = vrot.slane %v1697_v27, %v4901_v36  ;;  %v1635_v54 = vadd.f32 %v4887_v32, %v1536_v44  ;;  %v1636_v10 = vadd.f32 %v4905_v57, %v1537_v31  ;;  %v1614_v17 = vadd.f32 %v4909_v16, %v5134_v2  ;;  %v4318_v44 = vld [vmem:[%s5899_s3 + $0x48] sm:$0xff]  }
 0x284   : > { %v1637_v51 = vadd.f32 %v4898_v37, %v1538_v35  ;;  %v2006_v40 = vrot.slane %v1698_v63, %v4901_v36  ;;  %v2079_v9 = vsel %vm2023_vm9, %v1998_v50, %v1994_v30  ;;  %v1622_v39 = vadd.f32 %v4909_v16, %v5158_v58  ;;  %v4316_v30 = vld [vmem:[%s5899_s3] sm:$0xff]   ;;  %v4319_v35 = vld [vmem:[%s5899_s3 + $0x8] sm:$0xff]   ;;  %v4321_v63 = vld [vmem:[%s5899_s3 + $0x50] sm:$0xff]  }
 0x285   : > { %v1922_v12 = vrot.slane %v1677_v56, %v4901_v36  ;;  %v1699_v33 = vmax.f32 %v1635_v54, 0.0  ;;  %v1700_v32 = vmax.f32 %v1636_v10, 0.0  ;;  %v1678_v57 = vmax.f32 %v1614_v17, 0.0  ;;  %v4312_v50 = vld [vmem:[%s5899_s3 + $0x90] sm:$0xff]   ;;  %v4313_v54 = vld [vmem:[%s5899_s3 + $0x98] sm:$0xff]   ;;  %v4314_v17 = vld [vmem:[%s5899_s3 + $0xa0] sm:$0xff]  }
 0x286   : > { %v1701_v20 = vmax.f32 %v1637_v51, 0.0  ;;  %v1686_v5 = vmax.f32 %v1622_v39, 0.0  ;;  %v1954_v37 = vrot.slane %v1685_v8, %v4901_v36  ;;  %v2059_v2 = vsel %vm2025_vm10, %v5118_v41, %v5127_v61  ;;  %v4325_v10 = vld [vmem:[%s5899_s3 + $0x18] sm:$0xff]   ;;  %v4327_v51 = vld [vmem:[%s5899_s3 + $0x60] sm:$0xff]   ;;  %v4317_v39 = vld [vmem:[%s5899_s3 + $0xa8] sm:$0xff]  }
 0x287   : > { %v2066_v58 = vsel %vm2025_vm10, %v5163_v38, %v5174_v43  ;;  %v2010_v23 = vrot.slane %v1699_v33, %v4901_v36  ;;  %v2014_v56 = vrot.slane %v1700_v32, %v4901_v36  ;;  %v1926_v7 = vrot.slane %v1678_v57, %v4901_v36  ;;  %v4333_v33 = vld [vmem:[%s5899_s3 + $0x70] sm:$0xff]   ;;  %v4323_v57 = vld [vmem:[%s5899_s3 + $0xb8] sm:$0xff]  }
 0x288   : > { %v2060_v45 = vsel %vm2027_vm11, %v5124_v52, %v2059_v2  ;;  %v1958_v0 = vrot.slane %v1686_v5, %v4901_v36  ;;  %v2067_v41 = vsel %vm2027_vm11, %v5171_v14, %v2066_v58  ;;  %v1630_v61 = vadd.f32 %v4909_v16, %v5245_v24  ;;  %v4320_v32 = vld [vmem:[%s5899_s3 + $0xb0] sm:$0xff]   ;;  %v4326_v5 = vld [vmem:[%s5899_s3 + $0xc0] sm:$0xff]  }
 0x289   : > { %v2061_v8 = vsel %vm2029_vm12, %v5147_v47, %v2060_v45  ;;  %v2068_v43 = vsel %vm2029_vm12, %v5180_v6, %v2067_v41  ;;  %v1638_v1 = vadd.f32 %v4909_v16, %v1539_v13  ;;  %v1986_v52 = vrot.slane %v1693_v25, %v4901_v36  ;;  %v4324_v13 = vld [vmem:[%s5899_s3 + $0x58] sm:$0xff]   ;;  %v4332_v2 = vld [vmem:[%s5899_s3 + $0xd0] sm:$0xff]  }
 0x28a   : > { %v2062_v38 = vsel %vm2031_vm13, %v5151_v34, %v2061_v8  ;;  %v2069_v47 = vsel %vm2031_vm13, %v5189_v21, %v2068_v43  ;;  %v1694_v11 = vmax.f32 %v1630_v61, 0.0  ;;  %v2018_v14 = vrot.slane %v1701_v20, %v4901_v36  ;;  %v4334_v20 = vld [vmem:[%s5899_s3 + $0x30] sm:$0xff]  }
 0x28b   : > { %v2063_v49 = vsel %vm2033_vm14, %v1922_v12, %v2062_v38  ;;  %v2070_v4 = vsel %vm2033_vm14, %v1954_v37, %v2069_v47  ;;  %v1702_v34 = vmax.f32 %v1638_v1, 0.0  ;;  %v2073_v6 = vsel %vm2025_vm10, %v5223_v28, %v5236_v15  ;;  %v4331_v12 = vld [vmem:[%s5899_s3 + $0x28] sm:$0xff]   ;;  %v4338_v47 = vld [vmem:[%s5899_s3 + $0xe0] sm:$0xff]  }
 0x28c   : > { %v2064_v24 = vsel %vm2035_vm15, %v1926_v7, %v2063_v49  ;;  %v2071_v16 = vsel %vm2035_vm15, %v1958_v0, %v2070_v4  ;;  %v1990_v25 = vrot.slane %v1694_v11, %v4901_v36  ;;  %v2074_v55 = vsel %vm2027_vm11, %v5233_v3, %v2073_v6  ;;  %v4329_v37 = vld [vmem:[%s5899_s3 + $0xc8] sm:$0xff]   ;;  %v4337_v49 = vld [vmem:[%s5899_s3 + $0x38] sm:$0xff]  }
 0x28d   : > { %v2080_v21 = vsel %vm2025_vm10, %v2002_v48, %v2079_v9  ;;  %v4209_v22 = vpack.i.bf16 %v2071_v16, %v2064_v24  ;;  %v2022_v62 = vrot.slane %v1702_v34, %v4901_v36  ;;  %v2075_v19 = vsel %vm2029_vm12, %v5255_v29, %v2074_v55  ;;  %v4310_v29 = vld [vmem:[%s5899_s3 + $0x80] sm:$0xff]   ;;  %v4322_v48 = vld [vmem:[%s5899_s3 + $0x10] sm:$0xff]   ;;  %v4330_v9 = vld [vmem:[%s5899_s3 + $0x68] sm:$0xff]  }
 0x28e   : > { %v2081_v53 = vsel %vm2027_vm11, %v2006_v40, %v2080_v21  ;;  %v2076_v18 = vsel %vm2031_vm13, %v1982_v46, %v2075_v19  ;;  %v4315_v46 = vld [vmem:[%s5899_s3 + $0x40] sm:$0xff]   ;;  %2800 = vmatpush1.bf16.msra.mxu0 %v4310_v29  ;;  %v5926_v31 = vmov 0  }
 0x28f   : > { %v2082_v28 = vsel %vm2029_vm12, %v2010_v23, %v2081_v53  ;;  %4210 = vrot.lane.b32.xlu0 %v4209_v22, %s4448_s8  ;;  %v2077_v15 = vsel %vm2033_vm14, %v1986_v52, %v2076_v18  ;;  %2801 = vmatprep.subr.bf16.mxu0 %v5926_v31  ;;  %v4328_v40 = vld [vmem:[%s5899_s3 + $0x20] sm:$0xff]   ;;  %v4335_v23 = vld [vmem:[%s5899_s3 + $0xd8] sm:$0xff]  }
 0x290   : > { %v2083_v3 = vsel %vm2031_vm13, %v2014_v56, %v2082_v28  ;;  %v2078_v42 = vsel %vm2035_vm15, %v1990_v25, %v2077_v15  ;;  %3944 = vmatprep.subr.bf16.mxu1 %v4315_v46  ;;  %v4336_v52 = vld [vmem:[%s5899_s3 + $0x78] sm:$0xff]   ;;  %v4339_v15 = vld [vmem:[%s5899_s3 + $0xe8] sm:$0xff]  }
 0x291   : > { %v2084_v59 = vsel %vm2033_vm14, %v2018_v14, %v2083_v3  ;;  %3945 = vmatpush3.bf16.msra.mxu1 %v4316_v30 }
 0x292   : > { %v2085_v36 = vsel %vm2035_vm15, %v2022_v62, %v2084_v59  ;;  %3946 = vmatprep.subr.bf16.mxu1 %v4318_v44  ;;  %2802 = vmatpush1.bf16.msra.mxu0 %v4311_v26 }
 0x293   : > { %v4214_v27 = vpack.i.bf16 %v2085_v36, %v2078_v42  ;;  %2803 = vmatprep.subr.bf16.mxu0 %v5926_v31 }
 0x295   : > { %4215 = vrot.lane.b32.xlu1 %v4214_v27, %s4448_s8  ;;  %3947 = vmatpush3.bf16.msra.mxu1 %v4319_v35  ;;  %s3940_s8 = sshll.u32 %s4516_s28, 7  ;;  %s4372_s28 = scalar_lea.vmem %s5856_s14, 128 }
 0x296   : > { %3948 = vmatprep.subr.bf16.mxu1 %v4321_v63  ;;  %2804 = vmatpush1.bf16.msra.mxu0 %v4312_v50  ;;  %p4373_p6 = scmp.ne.s32.totalorder %s5856_s14, %s4372_s28 }
 0x297   : > { %2805 = vmatprep.subr.bf16.mxu0 %v5926_v31 }
 0x298   : > { %p4374_p10 = pnand %p4373_p6, %p5929_p9 }
 0x299   : > { %3949 = vmatpush3.bf16.msra.mxu1 %v4322_v48 }
 0x29a   : > { %3950 = vmatprep.subr.bf16.mxu1 %v4324_v13  ;;  %2806 = vmatpush1.bf16.msra.mxu0 %v4313_v54  ;;  %p4375_p12 = pneg %p4374_p10 }
 0x29b   : > { %2807 = vmatprep.subr.bf16.mxu0 %v5926_v31 }
 0x29d   : > { %3951 = vmatpush3.bf16.msra.mxu1 %v4325_v10 }
 0x29e   : > { %3952 = vmatprep.subr.bf16.mxu1 %v4327_v51  ;;  %2808 = vmatpush1.bf16.msra.mxu0 %v4314_v17 }
 0x29f   : > { %2809 = vmatprep.subr.bf16.mxu0 %v5926_v31 }
 0x2a1   : > { %3953 = vmatpush3.bf16.msra.mxu1 %v4328_v40 }
 0x2a2   : > { %3954 = vmatprep.subr.bf16.mxu1 %v4330_v9  ;;  %2810 = vmatpush1.bf16.msra.mxu0 %v4317_v39 }
 0x2a3   : > { %2811 = vmatprep.subr.bf16.mxu0 %v5926_v31 }
 0x2a5   : > { %3955 = vmatpush3.bf16.msra.mxu1 %v4331_v12 }
 0x2a6   : > { %3956 = vmatprep.subr.bf16.mxu1 %v4333_v33  ;;  %2812 = vmatpush1.bf16.msra.mxu0 %v4320_v32 }
 0x2a7   : > { %2813 = vmatprep.subr.bf16.mxu0 %v5926_v31 }
 0x2a9   : > { %3957 = vmatpush3.bf16.msra.mxu1 %v4334_v20 }
 0x2aa   : > { %2814 = vmatpush1.bf16.msra.mxu0 %v4323_v57  ;;  %3958 = vmatprep.subr.bf16.mxu1 %v4336_v52 }
 0x2ab   : > { %2815 = vmatprep.subr.bf16.mxu0 %v5926_v31 }
 0x2ad   : > { %3959 = vmatpush3.bf16.msra.mxu1 %v4337_v49 }
 0x2ae   : > { %2816 = vmatpush1.bf16.msra.mxu0 %v4326_v5 }
 0x2af   : > { %2817 = vmatprep.subr.bf16.mxu0 %v5926_v31 }
 0x2b2   : > { %2818 = vmatpush1.bf16.msra.mxu0 %v4329_v37 }
 0x2b3   : > { %2819 = vmatprep.subr.bf16.mxu0 %v5926_v31 }
 0x2b6   : > { %2820 = vmatpush1.bf16.msra.mxu0 %v4332_v2 }
 0x2b7   : > { %2821 = vmatprep.subr.bf16.mxu0 %v5926_v31 }
 0x2ba   : > { %2822 = vmatpush1.bf16.msra.mxu0 %v4335_v23 }
 0x2bb   : > { %2823 = vmatprep.subr.bf16.mxu0 %v5926_v31 }
 0x2be   : > { %2824 = vmatpush1.bf16.msra.mxu0 %v4338_v47 }
 0x2bf   : > { %2825 = vmatprep.subr.bf16.mxu0 %v5926_v31 }
 0x2c2   : > { %2826 = vmatpush1.bf16.msra.mxu0 %v4339_v15 }
 0x2cc   : > { %v4201_v58 = vpop.permute.xlu0 %4200 }
 0x2cd   : > { %v4203_v56 = vunpack.i.h.bf16 %v4201_v58  ;;  %v4202_v7 = vunpack.i.l.bf16 %v4201_v58 }
 0x2cf   : > { %v2112_v45 = vsel %vm2110_vm0, 0.0, %v4203_v56  ;;  %v2120_v0 = vsel %vm2110_vm0, %v4203_v56, 0.0  ;;  %v2111_v8 = vsel %vm2110_vm0, 0.0, %v4202_v7  ;;  %v2119_v41 = vsel %vm2110_vm0, %v4202_v7, 0.0 }
 0x2d0   : > { %v5424_v61 = vrot.slane %v2112_v45, 7  ;;  %v2146_v38 = vrot.slane %v2120_v0, 7  ;;  %v5426_v43 = vrot.slane %v2111_v8, 7  ;;  %v2144_v1 = vrot.slane %v2119_v41, 7 }
 0x2d2   : > { %v2177_v11 = vsel %vm428_vm2, 0.0, %v5424_v61  ;;  %v5441_v14 = vsel %vm428_vm2, 0.0, %v2146_v38  ;;  %v2193_v24 = vsel %vm428_vm2, %v5424_v61, 0.0  ;;  %v2194_v4 = vsel %vm428_vm2, %v2146_v38, 0.0 }
 0x2d3   : > { %v2248_v34 = vrot.slane %v5441_v14, 1  ;;  %v2249_v6 = vrot.slane %v2194_v4, 1  ;;  %v2353_v16 = vrot.slane %v5441_v14, 2  ;;  %v2354_v25 = vrot.slane %v2194_v4, 2 }
 0x2d4   : > { %v2175_v55 = vsel %vm428_vm2, 0.0, %v5426_v43  ;;  %v5451_v21 = vsel %vm428_vm2, 0.0, %v2144_v1  ;;  %v2191_v22 = vsel %vm428_vm2, %v5426_v43, 0.0  ;;  %v2192_v62 = vsel %vm428_vm2, %v2144_v1, 0.0 }
 0x2d5   : > { %v2242_v19 = vrot.slane %v5451_v21, 1  ;;  %v2243_v53 = vrot.slane %v2192_v62, 1  ;;  %v2347_v18 = vrot.slane %v5451_v21, 2  ;;  %v2348_v28 = vrot.slane %v2192_v62, 2 }
 0x2d6   : > { %v2239_v3 = vrot.slane %v2175_v55, 1  ;;  %v2240_v42 = vrot.slane %v2191_v22, 1  ;;  %v2245_v59 = vrot.slane %v2177_v11, 1  ;;  %v2246_v36 = vrot.slane %v2193_v24, 1 }
 0x2d7   : > { %v2244_v27 = vsel %vm509_vm4, %v2242_v19, %v2243_v53  ;;  %v2250_v29 = vsel %vm509_vm4, %v2248_v34, %v2249_v6  ;;  %v2344_v46 = vrot.slane %v2175_v55, 2  ;;  %v2345_v26 = vrot.slane %v2191_v22, 2 }
 0x2d8   : > { %v2241_v30 = vsel %vm509_vm4, %v2239_v3, %v2240_v42  ;;  %v2247_v44 = vsel %vm509_vm4, %v2245_v59, %v2246_v36  ;;  %v4229_v35 = vpack.i.bf16 %v2250_v29, %v2244_v27  ;;  %v2350_v63 = vrot.slane %v2177_v11, 2 }
 0x2d9   : > { %v4219_v31 = vpack.i.bf16 %v2247_v44, %v2241_v30  ;;  %v2351_v50 = vrot.slane %v2193_v24, 2  ;;  %v2346_v48 = vsel %vm598_vm3, %v2344_v46, %v2345_v26  ;;  %v2349_v13 = vsel %vm598_vm3, %v2347_v18, %v2348_v28 }
 0x2da   : > { %4230 = vrot.lane.b32.xlu1 %v4229_v35, %s4449_s19  ;;  %v2355_v54 = vsel %vm598_vm3, %v2353_v16, %v2354_v25  ;;  %v3876_v10 = vpack.c.bf16 %v5424_v61, %v5426_v43  ;;  %v4224_v40 = vpack.i.bf16 %v2349_v13, %v2346_v48 }
 0x2db   : > { %4220 = vrot.lane.b32.xlu0 %v4219_v31, %s4449_s19  ;;  %v2352_v51 = vsel %vm598_vm3, %v2350_v63, %v2351_v50 }
 0x2dc   : > { %v4234_v17 = vpack.i.bf16 %v2355_v54, %v2352_v51 }
 0x2de   : > { %4235 = vrot.lane.b32.xlu1 %v4234_v17, %s4450_s20 }
 0x2df   : > { %4225 = vrot.lane.b32.xlu0 %v4224_v40, %s4450_s20 }
 0x2ea   : > { %v4206_v9 = vpop.permute.xlu1 %4205 }
 0x2eb   : > { %v4208_v39 = vunpack.i.h.bf16 %v4206_v9  ;;  %v4207_v12 = vunpack.i.l.bf16 %v4206_v9 }
 0x2ed   : > { %v2114_v33 = vsel %vm2110_vm0, 0.0, %v4208_v39  ;;  %v2122_v32 = vsel %vm2110_vm0, %v4208_v39, 0.0  ;;  %v2113_v20 = vsel %vm2110_vm0, 0.0, %v4207_v12  ;;  %v2121_v57 = vsel %vm2110_vm0, %v4207_v12, 0.0 }
 0x2ee   : > { %v5480_v5 = vrot.slane %v2114_v33, 7  ;;  %v2150_v37 = vrot.slane %v2122_v32, 7  ;;  %v5482_v2 = vrot.slane %v2113_v20, 7  ;;  %v2148_v58 = vrot.slane %v2121_v57, 7 }
 0x2f0   : > { %v2181_v23 = vsel %vm428_vm2, 0.0, %v5480_v5  ;;  %v5487_v56 = vsel %vm428_vm2, 0.0, %v2150_v37  ;;  %v2197_v7 = vsel %vm428_vm2, %v5480_v5, 0.0  ;;  %v2198_v45 = vsel %vm428_vm2, %v2150_v37, 0.0 }
 0x2f1   : > { %v2260_v0 = vrot.slane %v5487_v56, 1  ;;  %v2261_v8 = vrot.slane %v2198_v45, 1  ;;  %v2365_v41 = vrot.slane %v5487_v56, 2  ;;  %v2366_v38 = vrot.slane %v2198_v45, 2 }
 0x2f2   : > { %v2179_v1 = vsel %vm428_vm2, 0.0, %v5482_v2  ;;  %v5497_v52 = vsel %vm428_vm2, 0.0, %v2148_v58  ;;  %v2195_v49 = vsel %vm428_vm2, %v5482_v2, 0.0  ;;  %v2196_v47 = vsel %vm428_vm2, %v2148_v58, 0.0 }
 0x2f3   : > { %v2254_v11 = vrot.slane %v5497_v52, 1  ;;  %v2255_v24 = vrot.slane %v2196_v47, 1  ;;  %v2359_v4 = vrot.slane %v5497_v52, 2  ;;  %v2360_v34 = vrot.slane %v2196_v47, 2 }
 0x2f4   : > { %v2251_v6 = vrot.slane %v2179_v1, 1  ;;  %v2252_v16 = vrot.slane %v2195_v49, 1  ;;  %v2257_v25 = vrot.slane %v2181_v23, 1  ;;  %v2258_v55 = vrot.slane %v2197_v7, 1 }
 0x2f5   : > { %v2256_v22 = vsel %vm509_vm4, %v2254_v11, %v2255_v24  ;;  %v2262_v62 = vsel %vm509_vm4, %v2260_v0, %v2261_v8  ;;  %v2356_v19 = vrot.slane %v2179_v1, 2  ;;  %v2357_v53 = vrot.slane %v2195_v49, 2 }
 0x2f6   : > { %v2253_v18 = vsel %vm509_vm4, %v2251_v6, %v2252_v16  ;;  %v2259_v28 = vsel %vm509_vm4, %v2257_v25, %v2258_v55  ;;  %v4249_v15 = vpack.i.bf16 %v2262_v62, %v2256_v22  ;;  %v2362_v42 = vrot.slane %v2181_v23, 2 }
 0x2f7   : > { %v4239_v3 = vpack.i.bf16 %v2259_v28, %v2253_v18  ;;  %v2363_v59 = vrot.slane %v2197_v7, 2  ;;  %v2358_v36 = vsel %vm598_vm3, %v2356_v19, %v2357_v53  ;;  %v2361_v27 = vsel %vm598_vm3, %v2359_v4, %v2360_v34 }
 0x2f8   : > { %4250 = vrot.lane.b32.xlu1 %v4249_v15, %s4449_s19  ;;  %v2367_v29 = vsel %vm598_vm3, %v2365_v41, %v2366_v38  ;;  %v3881_v46 = vpack.c.bf16 %v5480_v5, %v5482_v2  ;;  %v4244_v44 = vpack.i.bf16 %v2361_v27, %v2358_v36 }
 0x2f9   : > { %4240 = vrot.lane.b32.xlu0 %v4239_v3, %s4449_s19  ;;  %v2364_v26 = vsel %vm598_vm3, %v2362_v42, %v2363_v59 }
 0x2fa   : > { %v4254_v30 = vpack.i.bf16 %v2367_v29, %v2364_v26 }
 0x2fc   : > { %4255 = vrot.lane.b32.xlu1 %v4254_v30, %s4450_s20 }
 0x2fd   : > { %4245 = vrot.lane.b32.xlu0 %v4244_v44, %s4450_s20 }
 0x301   : > { %v4211_v35 = vpop.permute.xlu0 %4210 }
 0x302   : > { %v4213_v31 = vunpack.i.h.bf16 %v4211_v35  ;;  %v4212_v63 = vunpack.i.l.bf16 %v4211_v35 }
 0x304   : > { %v2116_v50 = vsel %vm2110_vm0, 0.0, %v4213_v31  ;;  %v2124_v48 = vsel %vm2110_vm0, %v4213_v31, 0.0  ;;  %v2115_v13 = vsel %vm2110_vm0, 0.0, %v4212_v63  ;;  %v2123_v54 = vsel %vm2110_vm0, %v4212_v63, 0.0 }
 0x305   : > { %v5522_v51 = vrot.slane %v2116_v50, 7  ;;  %v2154_v17 = vrot.slane %v2124_v48, 7  ;;  %v5524_v40 = vrot.slane %v2115_v13, 7  ;;  %v2152_v9 = vrot.slane %v2123_v54, 7 }
 0x307   : > { %v2185_v39 = vsel %vm428_vm2, 0.0, %v5522_v51  ;;  %v5529_v12 = vsel %vm428_vm2, 0.0, %v2154_v17  ;;  %v2201_v33 = vsel %vm428_vm2, %v5522_v51, 0.0  ;;  %v2202_v32 = vsel %vm428_vm2, %v2154_v17, 0.0  ;;  %v4216_v25 = vpop.permute.xlu1 %4215 }
 0x308   : > { %v2272_v20 = vrot.slane %v5529_v12, 1  ;;  %v2273_v57 = vrot.slane %v2202_v32, 1  ;;  %v2377_v37 = vrot.slane %v5529_v12, 2  ;;  %v2378_v58 = vrot.slane %v2202_v32, 2 }
 0x309   : > { %v2183_v23 = vsel %vm428_vm2, 0.0, %v5524_v40  ;;  %v5539_v7 = vsel %vm428_vm2, 0.0, %v2152_v9  ;;  %v2199_v45 = vsel %vm428_vm2, %v5524_v40, 0.0  ;;  %v2200_v0 = vsel %vm428_vm2, %v2152_v9, 0.0 }
 0x30a   : > { %v2266_v8 = vrot.slane %v5539_v7, 1  ;;  %v2267_v41 = vrot.slane %v2200_v0, 1  ;;  %v2371_v38 = vrot.slane %v5539_v7, 2  ;;  %v2372_v1 = vrot.slane %v2200_v0, 2 }
 0x30b   : > { %v2263_v49 = vrot.slane %v2183_v23, 1  ;;  %v2264_v47 = vrot.slane %v2199_v45, 1  ;;  %v2269_v11 = vrot.slane %v2185_v39, 1  ;;  %v2270_v24 = vrot.slane %v2201_v33, 1 }
 0x30c   : > { %v2268_v4 = vsel %vm509_vm4, %v2266_v8, %v2267_v41  ;;  %v2274_v34 = vsel %vm509_vm4, %v2272_v20, %v2273_v57  ;;  %v2368_v6 = vrot.slane %v2183_v23, 2  ;;  %v2369_v16 = vrot.slane %v2199_v45, 2 }
 0x30d   : > { %v2265_v55 = vsel %vm509_vm4, %v2263_v49, %v2264_v47  ;;  %v2271_v22 = vsel %vm509_vm4, %v2269_v11, %v2270_v24  ;;  %v4269_v62 = vpack.i.bf16 %v2274_v34, %v2268_v4  ;;  %v2373_v19 = vsel %vm598_vm3, %v2371_v38, %v2372_v1 }
 0x30e   : > { %v4259_v53 = vpack.i.bf16 %v2271_v22, %v2265_v55  ;;  %v2370_v18 = vsel %vm598_vm3, %v2368_v6, %v2369_v16  ;;  %v2374_v28 = vrot.slane %v2185_v39, 2  ;;  %v2375_v15 = vrot.slane %v2201_v33, 2 }
 0x30f   : > { %4270 = vrot.lane.b32.xlu1 %v4269_v62, %s4449_s19  ;;  %v2379_v3 = vsel %vm598_vm3, %v2377_v37, %v2378_v58  ;;  %v4218_v42 = vunpack.i.h.bf16 %v4216_v25  ;;  %v4217_v59 = vunpack.i.l.bf16 %v4216_v25  ;;  %v4264_v36 = vpack.i.bf16 %v2373_v19, %v2370_v18 }
 0x310   : > { %4260 = vrot.lane.b32.xlu0 %v4259_v53, %s4449_s19  ;;  %v2376_v27 = vsel %vm598_vm3, %v2374_v28, %v2375_v15  ;;  %v3886_v29 = vpack.c.bf16 %v5522_v51, %v5524_v40 }
 0x311   : > { %v4274_v26 = vpack.i.bf16 %v2379_v3, %v2376_v27  ;;  %v2118_v30 = vsel %vm2110_vm0, 0.0, %v4218_v42  ;;  %v2126_v44 = vsel %vm2110_vm0, %v4218_v42, 0.0  ;;  %v2117_v35 = vsel %vm2110_vm0, 0.0, %v4217_v59 }
 0x312   : > { %v5561_v31 = vrot.slane %v2118_v30, 7  ;;  %v2158_v63 = vrot.slane %v2126_v44, 7  ;;  %v2125_v50 = vsel %vm2110_vm0, %v4217_v59, 0.0  ;;  %v5564_v48 = vrot.slane %v2117_v35, 7 }
 0x313   : > { %4275 = vrot.lane.b32.xlu1 %v4274_v26, %s4450_s20  ;;  %v2156_v13 = vrot.slane %v2125_v50, 7 }
 0x314   : > { %4265 = vrot.lane.b32.xlu0 %v4264_v36, %s4450_s20  ;;  %v2189_v54 = vsel %vm428_vm2, 0.0, %v5561_v31  ;;  %v5571_v17 = vsel %vm428_vm2, 0.0, %v2158_v63  ;;  %v2205_v9 = vsel %vm428_vm2, %v5561_v31, 0.0  ;;  %v2206_v39 = vsel %vm428_vm2, %v2158_v63, 0.0 }
 0x315   : > { %v2284_v33 = vrot.slane %v5571_v17, 1  ;;  %v2285_v32 = vrot.slane %v2206_v39, 1  ;;  %v2389_v20 = vrot.slane %v5571_v17, 2  ;;  %v2390_v57 = vrot.slane %v2206_v39, 2 }
 0x316   : > { %v2187_v37 = vsel %vm428_vm2, 0.0, %v5564_v48  ;;  %v5581_v58 = vsel %vm428_vm2, 0.0, %v2156_v13  ;;  %v2203_v23 = vsel %vm428_vm2, %v5564_v48, 0.0  ;;  %v2204_v45 = vsel %vm428_vm2, %v2156_v13, 0.0 }
 0x317   : > { %v2278_v0 = vrot.slane %v5581_v58, 1  ;;  %v2279_v8 = vrot.slane %v2204_v45, 1  ;;  %v2383_v41 = vrot.slane %v5581_v58, 2  ;;  %v2384_v38 = vrot.slane %v2204_v45, 2 }
 0x318   : > { %v2286_v1 = vsel %vm509_vm4, %v2284_v33, %v2285_v32  ;;  %v2275_v49 = vrot.slane %v2187_v37, 1  ;;  %v2276_v47 = vrot.slane %v2203_v23, 1  ;;  %v2281_v11 = vrot.slane %v2189_v54, 1 }
 0x319   : > { %v2280_v24 = vsel %vm509_vm4, %v2278_v0, %v2279_v8  ;;  %v2282_v4 = vrot.slane %v2205_v9, 1  ;;  %v2386_v34 = vrot.slane %v2189_v54, 2  ;;  %v2387_v6 = vrot.slane %v2205_v9, 2 }
 0x31a   : > { %v4289_v16 = vpack.i.bf16 %v2286_v1, %v2280_v24  ;;  %v2277_v25 = vsel %vm509_vm4, %v2275_v49, %v2276_v47  ;;  %v2380_v55 = vrot.slane %v2187_v37, 2  ;;  %v2391_v19 = vsel %vm598_vm3, %v2389_v20, %v2390_v57 }
 0x31b   : > { %v2283_v22 = vsel %vm509_vm4, %v2281_v11, %v2282_v4  ;;  %v2388_v62 = vsel %vm598_vm3, %v2386_v34, %v2387_v6  ;;  %v2381_v53 = vrot.slane %v2203_v23, 2  ;;  %v3891_v28 = vpack.c.bf16 %v5561_v31, %v5564_v48  ;;  %vm3873_vm4 = vmneg %vm428_vm2 }
 0x31c   : > { %4290 = vrot.lane.b32.xlu1 %v4289_v16, %s4449_s19  ;;  %v4279_v18 = vpack.i.bf16 %v2283_v22, %v2277_v25  ;;  %v2385_v3 = vsel %vm598_vm3, %v2383_v41, %v2384_v38  ;;  %v4294_v42 = vpack.i.bf16 %v2391_v19, %v2388_v62  ;;  %vm2721_vm2 = vcmask 785408  }
 0x31d   : > { %v2382_v15 = vsel %vm598_vm3, %v2380_v55, %v2381_v53  ;;  %vm5607_vm3 = vmpackc.low %vm3873_vm4, %vm3873_vm4 }
 0x31e   : > { %4280 = vrot.lane.b32.xlu0 %v4279_v18, %s4449_s19  ;;  %v4284_v59 = vpack.i.bf16 %v2385_v3, %v2382_v15  ;;  %s5854_s19 = scalar_lea.hbm %s5903_s7, %s3940_s8 }
 0x320   : > { %4295 = vrot.lane.b32.xlu1 %v4294_v42, %s4450_s20 }
 0x322   : > { %4285 = vrot.lane.b32.xlu0 %v4284_v59, %s4450_s20  ;;  %s3667_s20 = scalar_lea.sflag [#allocation4], %s287_s15 }
 0x34c   : > { %v4231_v36 = vpop.permute.xlu1 %4230 }
 0x34d   : > { %v4221_v27 = vpop.permute.xlu0 %4220  ;;  %v4233_v44 = vunpack.i.h.bf16 %v4231_v36  ;;  %v4232_v35 = vunpack.i.l.bf16 %v4231_v36 }
 0x34e   : > { %v4223_v26 = vunpack.i.h.bf16 %v4221_v27  ;;  %v4222_v30 = vunpack.i.l.bf16 %v4221_v27 }
 0x350   : > { %v4236_v63 = vpop.permute.xlu1 %4235  ;;  %v2449_v50 = vsel %vm2319_vm1, %v5451_v21, %v4222_v30  ;;  %v2450_v13 = vsel %vm2319_vm1, %v5441_v14, %v4223_v26  ;;  %v2321_v20 = vsel %vm2319_vm1, %v4223_v26, %v4233_v44  ;;  %v2320_v23 = vsel %vm2319_vm1, %v4222_v30, %v4232_v35 }
 0x351   : > { %v4226_v54 = vpop.permute.xlu0 %4225  ;;  %v4238_v9 = vunpack.i.h.bf16 %v4236_v63  ;;  %v4237_v39 = vunpack.i.l.bf16 %v4236_v63  ;;  %v2466_v33 = vpack.c.bf16 %v2450_v13, %v2449_v50 }
 0x352   : > { %v4228_v57 = vunpack.i.h.bf16 %v4226_v54  ;;  %v4227_v37 = vunpack.i.l.bf16 %v4226_v54 }
 0x353   : > { %v2426_v45 = vsel %vm2424_vm5, %v4237_v39, %v4238_v9  ;;  %v2458_v21 = vsel %vm2424_vm5, %v2321_v20, %v4237_v39  ;;  %2766 = vmatprep.mubr.bf16.mxu1 %v2466_v33 }
 0x354   : > { %v2425_v14 = vsel %vm2424_vm5, %v4227_v37, %v4228_v57  ;;  %v2457_v0 = vsel %vm2424_vm5, %v2320_v23, %v4227_v37  ;;  %3877 = vmatmul.mubr.msk.bf16.vlgmr.msra.gmra.mrb[0].mxu1 %vm5607_vm3, %v3876_v10 }
 0x355   : > { %v2467_v8 = vpack.c.bf16 %v2458_v21, %v2457_v0  ;;  %v2468_v41 = vpack.c.bf16 %v2426_v45, %v2425_v14 }
 0x357   : > { %3893 = vmatprep.mubr.msk.bf16.mxu0 %vm2721_vm2, %v2468_v41 }
 0x358   : > { %2832 = vmatmul.mubr.bf16.vlgmr.msra.gmra.mrb[32].mxu0 %v2467_v8 }
 0x36a   : > { %v4251_v38 = vpop.permute.xlu1 %4250 }
 0x36b   : > { %v4241_v1 = vpop.permute.xlu0 %4240  ;;  %v4253_v11 = vunpack.i.h.bf16 %v4251_v38  ;;  %v4252_v24 = vunpack.i.l.bf16 %v4251_v38 }
 0x36c   : > { %v4243_v49 = vunpack.i.h.bf16 %v4241_v1  ;;  %v4242_v47 = vunpack.i.l.bf16 %v4241_v1 }
 0x36e   : > { %v4256_v4 = vpop.permute.xlu1 %4255  ;;  %v2451_v34 = vsel %vm2319_vm1, %v5497_v52, %v4242_v47  ;;  %v2452_v61 = vsel %vm2319_vm1, %v5487_v56, %v4243_v49  ;;  %v2323_v25 = vsel %vm2319_vm1, %v4243_v49, %v4253_v11  ;;  %v2322_v62 = vsel %vm2319_vm1, %v4242_v47, %v4252_v24 }
 0x36f   : > { %v4246_v43 = vpop.permute.xlu0 %4245  ;;  %v4258_v10 = vunpack.i.h.bf16 %v4256_v4  ;;  %v4257_v6 = vunpack.i.l.bf16 %v4256_v4  ;;  %v2470_v16 = vpack.c.bf16 %v2452_v61, %v2451_v34 }
 0x370   : > { %v4248_v55 = vunpack.i.h.bf16 %v4246_v43  ;;  %v4247_v22 = vunpack.i.l.bf16 %v4246_v43 }
 0x371   : > { %v2428_v19 = vsel %vm2424_vm5, %v4257_v6, %v4258_v10  ;;  %2774 = vmatprep.mubr.bf16.mxu1 %v2470_v16  ;;  %v2460_v53 = vsel %vm2424_vm5, %v2323_v25, %v4257_v6 }
 0x372   : > { %v2427_v52 = vsel %vm2424_vm5, %v4247_v22, %v4248_v55  ;;  %3882 = vmatmul.mubr.msk.bf16.gmra.mrb[4].mxu1 %vm5607_vm3, %v3881_v46  ;;  %v2459_v56 = vsel %vm2424_vm5, %v2322_v62, %v4247_v22 }
 0x373   : > { %v2472_v18 = vpack.c.bf16 %v2428_v19, %v2427_v52  ;;  %v2471_v15 = vpack.c.bf16 %v2460_v53, %v2459_v56 }
 0x375   : > { %3894 = vmatprep.mubr.msk.bf16.mxu0 %vm2721_vm2, %v2472_v18 }
 0x376   : > { %2840 = vmatmul.mubr.bf16.gmra.mrb[36].mxu0 %v2471_v15 }
 0x381   : > { %v4271_v3 = vpop.permute.xlu1 %4270 }
 0x382   : > { %v4261_v42 = vpop.permute.xlu0 %4260  ;;  %v4273_v27 = vunpack.i.h.bf16 %v4271_v3  ;;  %v4272_v26 = vunpack.i.l.bf16 %v4271_v3 }
 0x383   : > { %v4263_v59 = vunpack.i.h.bf16 %v4261_v42  ;;  %v4262_v36 = vunpack.i.l.bf16 %v4261_v42 }
 0x385   : > { %v4276_v30 = vpop.permute.xlu1 %4275  ;;  %v2453_v5 = vsel %vm2319_vm1, %v5539_v7, %v4262_v36  ;;  %v2454_v2 = vsel %vm2319_vm1, %v5529_v12, %v4263_v59  ;;  %v2325_v50 = vsel %vm2319_vm1, %v4263_v59, %v4273_v27  ;;  %v2324_v9 = vsel %vm2319_vm1, %v4262_v36, %v4272_v26 }
 0x386   : > { %v4266_v46 = vpop.permute.xlu0 %4265  ;;  %v4278_v44 = vunpack.i.h.bf16 %v4276_v30  ;;  %v4277_v35 = vunpack.i.l.bf16 %v4276_v30  ;;  %v2474_v63 = vpack.c.bf16 %v2454_v2, %v2453_v5 }
 0x387   : > { %v4268_v13 = vunpack.i.h.bf16 %v4266_v46  ;;  %v4267_v54 = vunpack.i.l.bf16 %v4266_v46 }
 0x388   : > { %v2430_v39 = vsel %vm2424_vm5, %v4277_v35, %v4278_v44  ;;  %2782 = vmatprep.mubr.bf16.mxu1 %v2474_v63  ;;  %v2462_v33 = vsel %vm2424_vm5, %v2325_v50, %v4277_v35 }
 0x389   : > { %v2429_v7 = vsel %vm2424_vm5, %v4267_v54, %v4268_v13  ;;  %3887 = vmatmul.mubr.msk.bf16.gmra.mrb[8].mxu1 %vm5607_vm3, %v3886_v29  ;;  %v2461_v12 = vsel %vm2424_vm5, %v2324_v9, %v4267_v54 }
 0x38a   : > { %v2476_v20 = vpack.c.bf16 %v2430_v39, %v2429_v7  ;;  %v2475_v57 = vpack.c.bf16 %v2462_v33, %v2461_v12 }
 0x38c   : > { %3895 = vmatprep.mubr.msk.bf16.mxu0 %vm2721_vm2, %v2476_v20 }
 0x38d   : > { %2848 = vmatmul.mubr.bf16.gmra.mrb[40].mxu0 %v2475_v57 }
 0x38e   : > { %v4291_v37 = vpop.permute.xlu1 %4290 }
 0x38f   : > { %v4293_v23 = vunpack.i.h.bf16 %v4291_v37  ;;  %v4292_v0 = vunpack.i.l.bf16 %v4291_v37  ;;  %v4340_v37 = vld [vmem:[#allocation2 + $0x8] sm:$0xff]  }
 0x390   : > { %v4281_v45 = vpop.permute.xlu0 %4280 }
 0x391   : > { %v4283_v21 = vunpack.i.h.bf16 %v4281_v45  ;;  %v4282_v14 = vunpack.i.l.bf16 %v4281_v45 }
 0x392   : > { %v4296_v8 = vpop.permute.xlu1 %4295 }
 0x393   : > { %v4298_v41 = vunpack.i.h.bf16 %v4296_v8  ;;  %v4297_v38 = vunpack.i.l.bf16 %v4296_v8  ;;  %v2327_v51 = vsel %vm2319_vm1, %v4283_v21, %v4293_v23  ;;  %v2455_v29 = vsel %vm2319_vm1, %v5581_v58, %v4282_v14 }
 0x394   : > { %v4286_v40 = vpop.permute.xlu0 %4285  ;;  %v2456_v1 = vsel %vm2319_vm1, %v5571_v17, %v4283_v21  ;;  %v2326_v4 = vsel %vm2319_vm1, %v4282_v14, %v4292_v0  ;;  %v4452_v21 = vmov 0.0  }
 0x395   : > { %v2432_v49 = vsel %vm2424_vm5, %v4297_v38, %v4298_v41  ;;  %v4288_v47 = vunpack.i.h.bf16 %v4286_v40  ;;  %v4287_v11 = vunpack.i.l.bf16 %v4286_v40  ;;  %v2478_v24 = vpack.c.bf16 %v2456_v1, %v2455_v29  ;;  %3992 = vmatprep.subr.bf16.mxu1 %v4452_v21 }
 0x396   : > { %v2464_v34 = vsel %vm2424_vm5, %v2327_v51, %v4297_v38  ;;  %3993 = vmatpush3.bf16.msra.mxu1 %v4340_v37 }
 0x397   : > { %v2431_v61 = vsel %vm2424_vm5, %v4287_v11, %v4288_v47  ;;  %2790 = vmatprep.mubr.bf16.mxu1 %v2478_v24  ;;  %v2463_v43 = vsel %vm2424_vm5, %v2326_v4, %v4287_v11  ;;  %3998 = vmatprep.subr.bf16.mxu1 %v4452_v21 }
 0x398   : > { %v2480_v10 = vpack.c.bf16 %v2432_v49, %v2431_v61  ;;  %3892 = vmatmul.mubr.msk.bf16.gmra.mrb[12].mxu1 %vm5607_vm3, %v3891_v28  ;;  %v2479_v17 = vpack.c.bf16 %v2464_v34, %v2463_v43  ;;  %v3929_v61 = vld [vmem:[%s5900_s4] ss:$0 sm:$0xff] }
 0x399   : > { %3994 = vmatprep.mubr.msk.bf16.mxu1 %vm4453_vm6, %v4452_v21 }
 0x39a   : > { %3896 = vmatprep.mubr.msk.bf16.mxu0 %vm2721_vm2, %v2480_v10 }
 0x39b   : > { %2856 = vmatmul.mubr.bf16.gmra.mrb[44].mxu0 %v2479_v17 }
 0x427   : > { %v3960_v58 = vpop.f32.mrb[0].mxu1 }
 0x428   : > { %v3961_v6 = vpop.f32.mrb[1].mxu1 }
 0x429   : > { %v3962_v16 = vadd.f32 %v3961_v6, %v3960_v58  ;;  %v3963_v25 = vpop.f32.mrb[2].mxu1 }
 0x42a   : > { %v3964_v55 = vpop.f32.mrb[3].mxu1 }
 0x42b   : > { %v3965_v22 = vadd.f32 %v3964_v55, %v3963_v25  ;;  %v2833_v62 = vpop.f32.mrb[32].mxu0  ;;  %v5702_v55 = vrot.slane %v3929_v61, %v4877_v60 }
 0x42c   : > { %v2834_v19 = vadd.f32 %v3962_v16, %v2833_v62  ;;  %v2835_v53 = vpop.f32.mrb[33].mxu0 }
 0x42d   : > { %v2836_v52 = vpop.f32.mrb[34].mxu0 }
 0x42e   : > { %v2837_v56 = vadd.f32 %v3965_v22, %v2836_v52  ;;  %v2838_v18 = vpop.f32.mrb[35].mxu0  ;;  %2872 = vrot.lane.b32.xlu0 %v2834_v19, %s4451_s16 }
 0x432   : > { %2874 = vrot.lane.b32.xlu0 %v2837_v56, %s4451_s16 }
 0x445   : > { %v3966_v31 = vpop.f32.mrb[4].mxu1 }
 0x446   : > { %v3967_v48 = vpop.f32.mrb[5].mxu1 }
 0x447   : > { %v3968_v28 = vadd.f32 %v3967_v48, %v3966_v31  ;;  %v3969_v32 = vpop.f32.mrb[6].mxu1 }
 0x448   : > { %v3970_v15 = vpop.f32.mrb[7].mxu1 }
 0x449   : > { %v3971_v3 = vadd.f32 %v3970_v15, %v3969_v32  ;;  %v2841_v42 = vpop.f32.mrb[36].mxu0  ;;  %v5711_v32 = vrot.slane %v5702_v55, 1 }
 0x44a   : > { %v2842_v59 = vadd.f32 %v3968_v28, %v2841_v42  ;;  %v2843_v36 = vpop.f32.mrb[37].mxu0  ;;  %v5708_v28 = vcombine.high %v5702_v55, %v5702_v55 }
 0x44b   : > { %v2844_v27 = vpop.f32.mrb[38].mxu0 }
 0x44c   : > { %v2845_v26 = vadd.f32 %v3971_v3, %v2844_v27  ;;  %v2846_v30 = vpop.f32.mrb[39].mxu0  ;;  %2876 = vrot.lane.b32.xlu1 %v2842_v59, %s4451_s16 }
 0x450   : > { %2878 = vrot.lane.b32.xlu1 %v2845_v26, %s4451_s16 }
 0x45c   : > { %v3972_v5 = vpop.f32.mrb[8].mxu1 }
 0x45d   : > { %v3973_v2 = vpop.f32.mrb[9].mxu1 }
 0x45e   : > { %v3974_v46 = vadd.f32 %v3973_v2, %v3972_v5  ;;  %v3975_v44 = vpop.f32.mrb[10].mxu1 }
 0x45f   : > { %v3976_v35 = vpop.f32.mrb[11].mxu1 }
 0x460   : > { %v3977_v63 = vadd.f32 %v3976_v35, %v3975_v44  ;;  %v2849_v50 = vpop.f32.mrb[40].mxu0 }
 0x461   : > { %v5675_v13 = vadd.f32 %v3974_v46, %v2849_v50  ;;  %v2851_v54 = vpop.f32.mrb[41].mxu0  ;;  %v5717_v46 = vrot.slane %v5708_v28, 1 }
 0x462   : > { %v2852_v9 = vpop.f32.mrb[42].mxu0 }
 0x463   : > { %v5677_v39 = vadd.f32 %v3977_v63, %v2852_v9  ;;  %v2854_v33 = vpop.f32.mrb[43].mxu0  ;;  %2880 = vrot.lane.b32.xlu0 %v5675_v13, %s4451_s16 }
 0x465   : > { %2882 = vrot.lane.b32.xlu1 %v5677_v39, %s4451_s16 }
 0x46b   : > { %v3978_v7 = vpop.f32.mrb[12].mxu1 }
 0x46c   : > { %v3979_v12 = vpop.f32.mrb[13].mxu1 }
 0x46d   : > { %v3980_v20 = vadd.f32 %v3979_v12, %v3978_v7  ;;  %v3981_v57 = vpop.f32.mrb[14].mxu1 }
 0x46e   : > { %v3982_v23 = vpop.f32.mrb[15].mxu1  ;;  %v2857_v45 = vpop.f32.mrb[44].mxu0 }
 0x46f   : > { %v3983_v14 = vadd.f32 %v3982_v23, %v3981_v57  ;;  %v5684_v0 = vadd.f32 %v3980_v20, %v2857_v45  ;;  %v2859_v8 = vpop.f32.mrb[45].mxu0 }
 0x470   : > { %v2860_v41 = vpop.f32.mrb[46].mxu0 }
 0x471   : > { %v5687_v38 = vadd.f32 %v3983_v14, %v2860_v41  ;;  %v2862_v51 = vpop.f32.mrb[47].mxu0  ;;  %2884 = vrot.lane.b32.xlu0 %v5684_v0, %s4451_s16 }
 0x473   : > { %2886 = vrot.lane.b32.xlu1 %v5687_v38, %s4451_s16  ;;  %s4454_s16 = smov [#allocation5]  }
 0x474   : > { %s4376_s21 = sshll.u32 %s4454_s16, 4  ;;  %s4377_s21 = int_to_ptr.vmem [resolvable:$false] %s4376_s21 }
 0x475   : > { %s4378_s13 = scalar_lea.vmem %s4377_s21, 256  ;;  %p4379_p2 = scmp.lt.s32.totalorder %s5856_s14, %s4377_s21 }
 0x476   : > { %p4380_p3 = scmp.lt.s32.totalorder %s4378_s13, %s4372_s28 }
 0x478   : > { %p4381_p4 = por %p4380_p3, %p4379_p2 }
 0x47a   : > { %p4382_p7 = pnand %p4381_p4, %p4375_p12 }
 0x4a0   : > { %v2873_v40 = vpop.permute.xlu0 %2872 }
 0x4a1   : > { %v2896_v1 = vmax.f32 %v2834_v19, %v2873_v40 }
 0x4a3   : > { %v2919_v47 = vrot.slane %v2896_v1, %v4877_v60  ;;  %v2912_v11 = vcombine.high %v2896_v1, %v2896_v1 }
 0x4a4   : > { %v2875_v29 = vpop.permute.xlu0 %2874 }
 0x4a5   : > { %v2897_v49 = vmax.f32 %v2837_v56, %v2875_v29  ;;  %v2927_v34 = vcombine.high %v2919_v47, %v2919_v47  ;;  %v2926_v43 = vrot.slane %v2912_v11, %v4877_v60  ;;  %v3897_v10 = vrot.slane %v2919_v47, 9 }
 0x4a7   : > { %v2936_v24 = vrot.slane %v2897_v49, %v4877_v60  ;;  %v2929_v17 = vcombine.high %v2897_v49, %v2897_v49  ;;  %v3898_v22 = vrot.slane %v2927_v34, 9  ;;  %v2928_v19 = vcombine.high %v2926_v43, %v2926_v43 }
 0x4a8   : > { %v3899_v53 = vrot.slane %v2926_v43, 9  ;;  %v3176_v52 = vmax.f32 %v2919_v47, %v3897_v10 }
 0x4a9   : > { %v2944_v58 = vcombine.high %v2936_v24, %v2936_v24  ;;  %v3901_v6 = vrot.slane %v2936_v24, 9  ;;  %v2943_v56 = vrot.slane %v2929_v17, %v4877_v60  ;;  %v3177_v15 = vmax.f32 %v2927_v34, %v3898_v22 }
 0x4aa   : > { %v3900_v42 = vrot.slane %v2928_v19, 9  ;;  %v3228_v36 = vadd.f32 %v5702_v55, %v3176_v52 }
 0x4ab   : > { %v3902_v18 = vrot.slane %v2944_v58, 9  ;;  %v3180_v31 = vmax.f32 %v2936_v24, %v3901_v6  ;;  %v2945_v27 = vcombine.high %v2943_v56, %v2943_v56  ;;  %v3229_v44 = vadd.f32 %v5711_v32, %v3177_v15 }
 0x4ac   : > { %v3179_v50 = vmax.f32 %v2928_v19, %v3900_v42  ;;  %v3260_v9 = vmax.f32 %v3228_v36, 0.0 }
 0x4ad   : > { %v3181_v30 = vmax.f32 %v2944_v58, %v3902_v18  ;;  %v3232_v5 = vadd.f32 %v5702_v55, %v3180_v31  ;;  %v3904_v7 = vrot.slane %v2945_v27, 9  ;;  %v3261_v14 = vmax.f32 %v3229_v44, 0.0 }
 0x4ae   : > { %v5724_v51 = vadd.f32 %v5717_v46, %v3179_v50  ;;  %v3292_v29 = vpack.c.bf16 %v3260_v9, %v3260_v9 }
 0x4af   : > { %v3233_v20 = vadd.f32 %v5711_v32, %v3181_v30  ;;  %v3264_v57 = vmax.f32 %v3232_v5, 0.0  ;;  %v3183_v49 = vmax.f32 %v2945_v27, %v3904_v7 }
 0x4b0   : > { %v3263_v6 = vmax.f32 %v5724_v51, 0.0 }
 0x4b1   : > { %v3265_v11 = vmax.f32 %v3233_v20, 0.0  ;;  %v3293_v24 = vpack.c.bf16 %v3264_v57, %v3264_v57 }
 0x4b3   : > { %v3402_v52 = vunpack.c.l.b16 %v3293_v24 }
 0x4be   : > { %v2877_v4 = vpop.permute.xlu1 %2876 }
 0x4bf   : > { %v2898_v25 = vmax.f32 %v2842_v59, %v2877_v4  ;;  %v3178_v59 = vmax.f32 %v2926_v43, %v3899_v53  ;;  %v5728_v43 = vpack.c.bf16 %v3261_v14, %v3261_v14  ;;  %v3303_v53 = vpack.c.bf16 %v3265_v11, %v3265_v11 }
 0x4c1   : > { %v2953_v48 = vrot.slane %v2898_v25, %v4877_v60  ;;  %v2946_v35 = vcombine.high %v2898_v25, %v2898_v25  ;;  %v3230_v54 = vadd.f32 %v5708_v28, %v3178_v59 }
 0x4c2   : > { %v2879_v16 = vpop.permute.xlu1 %2878 }
 0x4c3   : > { %v2899_v62 = vmax.f32 %v2845_v26, %v2879_v16  ;;  %v3903_v26 = vrot.slane %v2943_v56, 9  ;;  %v2961_v2 = vcombine.high %v2953_v48, %v2953_v48  ;;  %v3905_v33 = vrot.slane %v2953_v48, 9 }
 0x4c4   : > { %v2960_v8 = vrot.slane %v2946_v35, %v4877_v60  ;;  %v3262_v40 = vmax.f32 %v3230_v54, 0.0  ;;  %v3401_v16 = vunpack.c.l.b16 %v3292_v29  ;;  %v3322_v35 = vunpack.c.l.b16 %v3303_v53 }
 0x4c5   : > { %v2970_v3 = vrot.slane %v2899_v62, %v4877_v60  ;;  %v3182_v12 = vmax.f32 %v2943_v56, %v3903_v26  ;;  %v3906_v37 = vrot.slane %v2961_v2, 9  ;;  %v2963_v23 = vcombine.high %v2899_v62, %v2899_v62 }
 0x4c6   : > { %v3184_v1 = vmax.f32 %v2953_v48, %v3905_v33  ;;  %v2962_v10 = vcombine.high %v2960_v8, %v2960_v8  ;;  %v3907_v17 = vrot.slane %v2960_v8, 9  ;;  %v5731_v25 = vpack.c.bf16 %v3262_v40, %v3262_v40 }
 0x4c7   : > { %v2978_v63 = vcombine.high %v2970_v3, %v2970_v3  ;;  %v3909_v45 = vrot.slane %v2970_v3, 9  ;;  %v3234_v47 = vadd.f32 %v5708_v28, %v3182_v12  ;;  %v3185_v4 = vmax.f32 %v2961_v2, %v3906_v37 }
 0x4c8   : > { %v2977_v34 = vrot.slane %v2963_v23, %v4877_v60  ;;  %v3236_v22 = vadd.f32 %v5702_v55, %v3184_v1  ;;  %v3235_v62 = vadd.f32 %v5717_v46, %v3183_v49  ;;  %v3908_v42 = vrot.slane %v2962_v10, 9 }
 0x4c9   : > { %v3910_v41 = vrot.slane %v2978_v63, 9  ;;  %v3188_v61 = vmax.f32 %v2970_v3, %v3909_v45  ;;  %v3266_v19 = vmax.f32 %v3234_v47, 0.0  ;;  %v3237_v18 = vadd.f32 %v5711_v32, %v3185_v4 }
 0x4ca   : > { %v3911_v31 = vrot.slane %v2977_v34, 9  ;;  %v3321_v3 = vunpack.c.l.b16 %v5728_v43  ;;  %v3186_v59 = vmax.f32 %v2960_v8, %v3907_v17  ;;  %v3268_v26 = vmax.f32 %v3236_v22, 0.0 }
 0x4cb   : > { %v3189_v58 = vmax.f32 %v2978_v63, %v3910_v41  ;;  %v3240_v48 = vadd.f32 %v5702_v55, %v3188_v61  ;;  %v2979_v30 = vcombine.high %v2977_v34, %v2977_v34  ;;  %v3267_v44 = vmax.f32 %v3235_v62, 0.0 }
 0x4cc   : > { %v3409_v63 = vrot.slane %v3402_v52, 7  ;;  %v3474_v50 = vpack.c.bf16 %v3266_v19, %v3266_v19  ;;  %v3269_v54 = vmax.f32 %v3237_v18, 0.0  ;;  %v3190_v9 = vmax.f32 %v2977_v34, %v3911_v31 }
 0x4cd   : > { %v3241_v36 = vadd.f32 %v5711_v32, %v3189_v58  ;;  %v3238_v7 = vadd.f32 %v5708_v28, %v3186_v59  ;;  %v3492_v37 = vunpack.c.l.b16 %v5731_v25  ;;  %v3187_v23 = vmax.f32 %v2962_v10, %v3908_v42 }
 0x4ce   : > { %v3294_v45 = vpack.c.bf16 %v3268_v26, %v3268_v26  ;;  %v3912_v14 = vrot.slane %v2979_v30, 9  ;;  %v5745_v8 = vpack.c.bf16 %v3267_v44, %v3267_v44  ;;  %v3329_v29 = vrot.slane %v3322_v35, 7 }
 0x4cf   : > { %v3273_v12 = vmax.f32 %v3241_v36, 0.0  ;;  %v3304_v1 = vpack.c.bf16 %v3269_v54, %v3269_v54  ;;  %v3242_v49 = vadd.f32 %v5708_v28, %v3190_v9  ;;  %v3410_v11 = vsel %vm2023_vm9, %v3409_v63, %v3401_v16 }
 0x4d0   : > { %v3270_v24 = vmax.f32 %v3238_v7, 0.0  ;;  %v3239_v61 = vadd.f32 %v5717_v46, %v3187_v23  ;;  %v3403_v43 = vunpack.c.l.b16 %v3294_v45  ;;  %v3191_v10 = vmax.f32 %v2979_v30, %v3912_v14 }
 0x4d1   : > { %v3305_v4 = vpack.c.bf16 %v3273_v12, %v3273_v12  ;;  %v3330_v19 = vsel %vm2023_vm9, %v3329_v29, %v3321_v3  ;;  %v3323_v53 = vunpack.c.l.b16 %v3304_v1  ;;  %v3274_v52 = vmax.f32 %v3242_v49, 0.0 }
 0x4d2   : > { %v5752_v18 = vpack.c.bf16 %v3270_v24, %v3270_v24  ;;  %v3411_v42 = vrot.slane %v3403_v43, 6  ;;  %v5755_v59 = vadd.f32 %v5717_v46, %v3191_v10 }
 0x4d3   : > { %v3324_v16 = vunpack.c.l.b16 %v3305_v4  ;;  %v3331_v44 = vrot.slane %v3323_v53, 6  ;;  %v5762_v63 = vpack.c.bf16 %v3274_v52, %v3274_v52 }
 0x4d4   : > { %v3275_v12 = vmax.f32 %v5755_v59, 0.0 }
 0x4d5   : > { %v2881_v56 = vpop.permute.xlu0 %2880  ;;  %v3333_v54 = vrot.slane %v3324_v16, 5  ;;  %v3495_v29 = vunpack.c.l.b16 %v5762_v63 }
 0x4d6   : > { %v2900_v15 = vmax.f32 %v5675_v13, %v2881_v56  ;;  %v3272_v13 = vmax.f32 %v3240_v48, 0.0 }
 0x4d7   : > { %v2883_v27 = vpop.permute.xlu1 %2882 }
 0x4d8   : > { %v2987_v5 = vrot.slane %v2900_v15, %v4877_v60  ;;  %v2901_v2 = vmax.f32 %v5677_v39, %v2883_v27  ;;  %v2980_v20 = vcombine.high %v2900_v15, %v2900_v15  ;;  %v3493_v39 = vunpack.c.l.b16 %v3474_v50 }
 0x4d9   : > { %v3295_v47 = vpack.c.bf16 %v3272_v13, %v3272_v13  ;;  %v3271_v15 = vmax.f32 %v3239_v61, 0.0  ;;  %v3494_v50 = vunpack.c.l.b16 %v5752_v18 }
 0x4da   : > { %v2995_v33 = vcombine.high %v2987_v5, %v2987_v5  ;;  %v3004_v57 = vrot.slane %v2901_v2, %v4877_v60  ;;  %v2994_v34 = vrot.slane %v2980_v20, %v4877_v60  ;;  %v3913_v17 = vrot.slane %v2987_v5, 9 }
 0x4db   : > { %v3500_v58 = vrot.slane %v3493_v39, 7  ;;  %v2997_v22 = vcombine.high %v2901_v2, %v2901_v2  ;;  %v3404_v56 = vunpack.c.l.b16 %v3295_v47  ;;  %v5766_v7 = vpack.c.bf16 %v3271_v15, %v3271_v15 }
 0x4dc   : > { %v3914_v41 = vrot.slane %v2995_v33, 9  ;;  %v3012_v40 = vcombine.high %v3004_v57, %v3004_v57  ;;  %v2996_v31 = vcombine.high %v2994_v34, %v2994_v34  ;;  %v3915_v48 = vrot.slane %v2994_v34, 9 }
 0x4dd   : > { %v3192_v36 = vmax.f32 %v2987_v5, %v3913_v17  ;;  %v3011_v26 = vrot.slane %v2997_v22, %v4877_v60  ;;  %v3917_v30 = vrot.slane %v3004_v57, 9  ;;  %v5760_v2 = vsel %vm2023_vm9, %v3500_v58, %v3492_v37 }
 0x4de   : > { %v3193_v25 = vmax.f32 %v2995_v33, %v3914_v41  ;;  %v3918_v62 = vrot.slane %v3012_v40, 9  ;;  %v3413_v35 = vrot.slane %v3404_v56, 5  ;;  %v3916_v9 = vrot.slane %v2996_v31, 9 }
 0x4df   : > { %v3194_v13 = vmax.f32 %v2994_v34, %v3915_v48  ;;  %v3412_v5 = vsel %vm2025_vm10, %v3411_v42, %v3410_v11  ;;  %v3244_v20 = vadd.f32 %v5702_v55, %v3192_v36  ;;  %v3013_v23 = vcombine.high %v3011_v26, %v3011_v26 }
 0x4e0   : > { %v3245_v27 = vadd.f32 %v5711_v32, %v3193_v25  ;;  %v3197_v3 = vmax.f32 %v3012_v40, %v3918_v62  ;;  %v3196_v45 = vmax.f32 %v3004_v57, %v3917_v30  ;;  %v3332_v41 = vsel %vm2025_vm10, %v3331_v44, %v3330_v19 }
 0x4e1   : > { %v5773_v40 = vsel %vm2027_vm11, %v3413_v35, %v3412_v5  ;;  %v3334_v49 = vsel %vm2027_vm11, %v3333_v54, %v3332_v41  ;;  %v3195_v47 = vmax.f32 %v2996_v31, %v3916_v9  ;;  %v3246_v11 = vadd.f32 %v5708_v28, %v3194_v13 }
 0x4e2   : > { %v3277_v37 = vmax.f32 %v3245_v27, 0.0  ;;  %v3249_v14 = vadd.f32 %v5711_v32, %v3197_v3  ;;  %v3919_v24 = vrot.slane %v3011_v26, 9  ;;  %v3276_v4 = vmax.f32 %v3244_v20, 0.0 }
 0x4e3   : > { %v2885_v33 = vpop.permute.xlu0 %2884  ;;  %v3920_v10 = vrot.slane %v3013_v23, 9  ;;  %v3248_v17 = vadd.f32 %v5702_v55, %v3196_v45  ;;  %v5784_v19 = vadd.f32 %v5717_v46, %v3195_v47  ;;  %v3278_v53 = vmax.f32 %v3246_v11, 0.0 }
 0x4e4   : > { %v2902_v1 = vmax.f32 %v5684_v0, %v2885_v33  ;;  %v3306_v43 = vpack.c.bf16 %v3277_v37, %v3277_v37  ;;  %v3281_v58 = vmax.f32 %v3249_v14, 0.0  ;;  %v3198_v52 = vmax.f32 %v3011_v26, %v3919_v24 }
 0x4e5   : > { %v2887_v39 = vpop.permute.xlu1 %2886  ;;  %v3296_v16 = vpack.c.bf16 %v3276_v4, %v3276_v4  ;;  %v3280_v3 = vmax.f32 %v3248_v17, 0.0  ;;  %v3199_v54 = vmax.f32 %v3013_v23, %v3920_v10  ;;  %v3477_v17 = vpack.c.bf16 %v3278_v53, %v3278_v53 }
 0x4e6   : > { %v3014_v57 = vcombine.high %v2902_v1, %v2902_v1  ;;  %v3021_v34 = vrot.slane %v2902_v1, %v4877_v60  ;;  %v2903_v61 = vmax.f32 %v5687_v38, %v2887_v39  ;;  %v3307_v15 = vpack.c.bf16 %v3281_v58, %v3281_v58 }
 0x4e7   : > { %v3325_v30 = vunpack.c.l.b16 %v3306_v43  ;;  %v3250_v45 = vadd.f32 %v5708_v28, %v3198_v52  ;;  %v3405_v1 = vunpack.c.l.b16 %v3296_v16  ;;  %v3297_v47 = vpack.c.bf16 %v3280_v3, %v3280_v3 }
 0x4e8   : > { %v3028_v25 = vrot.slane %v3014_v57, %v4877_v60  ;;  %v3029_v0 = vcombine.high %v3021_v34, %v3021_v34  ;;  %v3921_v22 = vrot.slane %v3021_v34, 9  ;;  %v3031_v62 = vcombine.high %v2903_v61, %v2903_v61 }
 0x4e9   : > { %v3038_v56 = vrot.slane %v2903_v61, %v4877_v60  ;;  %v3326_v14 = vunpack.c.l.b16 %v3307_v15  ;;  %v3335_v41 = vrot.slane %v3325_v30, 4  ;;  %v3282_v58 = vmax.f32 %v3250_v45, 0.0 }
 0x4ea   : > { %v3922_v31 = vrot.slane %v3029_v0, 9  ;;  %v3923_v38 = vrot.slane %v3028_v25, 9  ;;  %v3200_v48 = vmax.f32 %v3021_v34, %v3921_v22  ;;  %v3045_v42 = vrot.slane %v3031_v62, %v4877_v60 }
 0x4eb   : > { %v3046_v36 = vcombine.high %v3038_v56, %v3038_v56  ;;  %v3925_v27 = vrot.slane %v3038_v56, 9  ;;  %v3030_v33 = vcombine.high %v3028_v25, %v3028_v25  ;;  %v3415_v22 = vrot.slane %v3405_v1, 4 }
 0x4ec   : > { %v3201_v44 = vmax.f32 %v3029_v0, %v3922_v31  ;;  %v3252_v35 = vadd.f32 %v5702_v55, %v3200_v48  ;;  %v3927_v13 = vrot.slane %v3045_v42, 9  ;;  %v3202_v5 = vmax.f32 %v3028_v25, %v3923_v38 }
 0x4ed   : > { %v3926_v9 = vrot.slane %v3046_v36, 9  ;;  %v3204_v26 = vmax.f32 %v3038_v56, %v3925_v27  ;;  %v3047_v24 = vcombine.high %v3045_v42, %v3045_v42  ;;  %v3924_v34 = vrot.slane %v3030_v33, 9 }
 0x4ee   : > { %v3253_v20 = vadd.f32 %v5711_v32, %v3201_v44  ;;  %v3284_v37 = vmax.f32 %v3252_v35, 0.0  ;;  %v3206_v23 = vmax.f32 %v3045_v42, %v3927_v13  ;;  %v3254_v61 = vadd.f32 %v5708_v28, %v3202_v5 }
 0x4ef   : > { %v3205_v60 = vmax.f32 %v3046_v36, %v3926_v9  ;;  %v3256_v39 = vadd.f32 %v5702_v55, %v3204_v26  ;;  %v3337_v25 = vrot.slane %v3326_v14, 3  ;;  %v3336_v55 = vsel %vm2029_vm12, %v3335_v41, %v3334_v49 }
 0x4f0   : > { %v3285_v11 = vmax.f32 %v3253_v20, 0.0  ;;  %v3298_v43 = vpack.c.bf16 %v3284_v37, %v3284_v37  ;;  %v3406_v62 = vunpack.c.l.b16 %v3297_v47  ;;  %v3928_v56 = vrot.slane %v3047_v24, 9 }
 0x4f1   : > { %v3257_v4 = vadd.f32 %v5711_v32, %v3205_v60  ;;  %v3288_v57 = vmax.f32 %v3256_v39, 0.0  ;;  %v3258_v16 = vadd.f32 %v5708_v28, %v3206_v23  ;;  %v3203_v38 = vmax.f32 %v3030_v33, %v3924_v34  ;;  %v4341_v60 = vld [vmem:[#allocation2] sm:$0xff]  }
 0x4f2   : > { %v3308_v10 = vpack.c.bf16 %v3285_v11, %v3285_v11  ;;  %v3286_v48 = vmax.f32 %v3254_v61, 0.0  ;;  %v3407_v42 = vunpack.c.l.b16 %v3298_v43  ;;  %v3279_v36 = vmax.f32 %v5784_v19, 0.0 }
 0x4f3   : > { %v3289_v0 = vmax.f32 %v3257_v4, 0.0  ;;  %v3299_v31 = vpack.c.bf16 %v3288_v57, %v3288_v57  ;;  %v3251_v53 = vadd.f32 %v5717_v46, %v3199_v54  ;;  %v3338_v27 = vsel %vm2031_vm13, %v3337_v25, %v3336_v55 }
 0x4f4   : > { %v3327_v52 = vunpack.c.l.b16 %v3308_v10  ;;  %v3496_v49 = vunpack.c.l.b16 %v3477_v17  ;;  %v3417_v3 = vrot.slane %v3406_v62, 3  ;;  %v3478_v44 = vpack.c.bf16 %v3282_v58, %v3282_v58 }
 0x4f5   : > { %v3309_v32 = vpack.c.bf16 %v3289_v0, %v3289_v0  ;;  %v3207_v9 = vmax.f32 %v3047_v24, %v3928_v56  ;;  %v3290_v28 = vmax.f32 %v3258_v16, 0.0  ;;  %v3408_v26 = vunpack.c.l.b16 %v3299_v31  ;;  %v4342_v0 = vld [vmem:[#allocation2 + $0x10] sm:$0xff]  }
 0x4f6   : > { %v3339_v15 = vrot.slane %v3327_v52, 2  ;;  %v3416_v33 = vsel %vm2029_vm12, %v3415_v22, %v5773_v40  ;;  %v3255_v5 = vadd.f32 %v5717_v46, %v3203_v38  ;;  %v3419_v19 = vrot.slane %v3407_v42, 2 }
 0x4f7   : > { %v3328_v30 = vunpack.c.l.b16 %v3309_v32  ;;  %v3479_v20 = vpack.c.bf16 %v3286_v48, %v3286_v48  ;;  %v3502_v54 = vrot.slane %v3494_v50, 6  ;;  %v3504_v37 = vrot.slane %v3495_v29, 5 }
 0x4f8   : > { %v3340_v35 = vsel %vm2033_vm14, %v3339_v15, %v3338_v27  ;;  %v3568_v45 = vpack.c.bf16 %v3275_v12, %v3275_v12  ;;  %v3569_v39 = vpack.c.bf16 %v3279_v36, %v3279_v36  ;;  %v3283_v41 = vmax.f32 %v3251_v53, 0.0 }
 0x4f9   : > { %v3341_v13 = vrot.slane %v3328_v30, 1  ;;  %v3497_v40 = vunpack.c.l.b16 %v3478_v44  ;;  %v3418_v47 = vsel %vm2031_vm13, %v3417_v3, %v3416_v33  ;;  %v3259_v11 = vadd.f32 %v5717_v46, %v3207_v9  ;;  %v4343_v44 = vld [vmem:[#allocation2 + $0x18] sm:$0xff]  }
 0x4fa   : > { %v3421_v18 = vrot.slane %v3408_v26, 1  ;;  %v3480_v50 = vpack.c.bf16 %v3290_v28, %v3290_v28  ;;  %v3506_v24 = vrot.slane %v3496_v49, 4  ;;  %v3287_v63 = vmax.f32 %v3255_v5, 0.0 }
 0x4fb   : > { %v3342_v14 = vsel %vm2035_vm15, %v3341_v13, %v3340_v35  ;;  %v3498_v29 = vunpack.c.l.b16 %v3479_v20  ;;  %v3420_v59 = vsel %vm2033_vm14, %v3419_v19, %v3418_v47  ;;  %v3565_v12 = vpack.c.bf16 %v3263_v6, %v3263_v6 }
 0x4fc   : > { %v3343_v1 = vpack.c.b16 %v3342_v14, %v3342_v14  ;;  %v3585_v23 = vunpack.c.l.b16 %v5745_v8  ;;  %v3503_v4 = vsel %vm2025_vm10, %v3502_v54, %v5760_v2  ;;  %v3586_v46 = vunpack.c.l.b16 %v5766_v7 }
 0x4fd   : > { %v3505_v57 = vsel %vm2027_vm11, %v3504_v37, %v3503_v4  ;;  %v3587_v34 = vunpack.c.l.b16 %v3568_v45  ;;  %v3570_v61 = vpack.c.bf16 %v3283_v41, %v3283_v41  ;;  %v3508_v51 = vrot.slane %v3497_v40, 3 }
 0x4fe   : > { %3995 = vmatmul.mubr.msk.bf16.vlgmr.msra.gmra.mrb[16].mxu1 %vm2110_vm0, %v3343_v1  ;;  %v3291_v43 = vmax.f32 %v3259_v11, 0.0  ;;  %v3499_v6 = vunpack.c.l.b16 %v3480_v50  ;;  %v3422_v8 = vsel %vm2035_vm15, %v3421_v18, %v3420_v59  ;;  %v3507_v10 = vsel %vm2029_vm12, %v3506_v24, %v3505_v57  ;;  %v3938_v18 = vld [vmem:[%s5902_s6] ss:$0 sm:$0xff] }
 0x4ff   : > { %3999 = vmatpush3.bf16.msra.mxu1 %v4341_v60  ;;  %4000 = vmatprep.mubr.msk.bf16.mxu1 %vm4453_vm6, %v4452_v21  ;;  %v3588_v2 = vunpack.c.l.b16 %v3569_v39  ;;  %v3510_v17 = vrot.slane %v3498_v29, 2  ;;  %v3571_v58 = vpack.c.bf16 %v3287_v63, %v3287_v63  ;;  %v3592_v25 = vrot.slane %v3585_v23, 7 }
 0x500   : > { %4004 = vmatprep.subr.bf16.mxu1 %v4452_v21  ;;  %v3584_v55 = vunpack.c.l.b16 %v3565_v12  ;;  %v3594_v7 = vrot.slane %v3586_v46, 6  ;;  %v3596_v22 = vrot.slane %v3587_v34, 5  ;;  %v3423_v62 = vpack.c.b16 %v3422_v8, %v3422_v8 }
 0x501   : > { %v3589_v52 = vunpack.c.l.b16 %v3570_v61  ;;  %v3512_v56 = vrot.slane %v3499_v6, 1  ;;  %v3572_v16 = vpack.c.bf16 %v3291_v43, %v3291_v43  ;;  %v3509_v31 = vsel %vm2031_vm13, %v3508_v51, %v3507_v10 }
 0x502   : > { %v3598_v32 = vrot.slane %v3588_v2, 4  ;;  %v3590_v38 = vunpack.c.l.b16 %v3571_v58  ;;  %v3511_v48 = vsel %vm2033_vm14, %v3510_v17, %v3509_v31  ;;  %v3593_v15 = vsel %vm2023_vm9, %v3592_v25, %v3584_v55 }
 0x503   : > { %v3595_v42 = vsel %vm2025_vm10, %v3594_v7, %v3593_v15  ;;  %v3600_v53 = vrot.slane %v3589_v52, 3  ;;  %v3591_v27 = vunpack.c.l.b16 %v3572_v16  ;;  %v3513_v30 = vsel %vm2035_vm15, %v3512_v56, %v3511_v48 }
 0x504   : > { %v3597_v36 = vsel %vm2027_vm11, %v3596_v22, %v3595_v42  ;;  %v3602_v49 = vrot.slane %v3590_v38, 2  ;;  %v3514_v35 = vpack.c.b16 %v3513_v30, %v3513_v30 }
 0x505   : > { %v3599_v3 = vsel %vm2029_vm12, %v3598_v32, %v3597_v36  ;;  %v3604_v9 = vrot.slane %v3591_v27, 1 }
 0x506   : > { %4001 = vmatmul.mubr.msk.bf16.vlgmr.msra.gmra.mrb[20].mxu1 %vm2110_vm0, %v3423_v62  ;;  %v3601_v28 = vsel %vm2031_vm13, %v3600_v53, %v3599_v3 }
 0x507   : > { %4005 = vmatpush3.bf16.msra.mxu1 %v4342_v0  ;;  %4006 = vmatprep.mubr.msk.bf16.mxu1 %vm4453_vm6, %v4452_v21  ;;  %v3603_v13 = vsel %vm2033_vm14, %v3602_v49, %v3601_v28 }
 0x508   : > { %4010 = vmatprep.subr.bf16.mxu1 %v4452_v21  ;;  %v3605_v26 = vsel %vm2035_vm15, %v3604_v9, %v3603_v13 }
 0x509   : > { %v3606_v33 = vpack.c.b16 %v3605_v26, %v3605_v26 }
 0x50e   : > { %4007 = vmatmul.mubr.msk.bf16.vlgmr.msra.gmra.mrb[24].mxu1 %vm2110_vm0, %v3514_v35 }
 0x50f   : > { %4011 = vmatpush3.bf16.msra.mxu1 %v4343_v44  ;;  %4012 = vmatprep.mubr.msk.bf16.mxu1 %vm4453_vm6, %v4452_v21 }
 0x516   : > { %4013 = vmatmul.mubr.msk.bf16.vlgmr.msra.gmra.mrb[28].mxu1 %vm2110_vm0, %v3606_v33 }
 0x5d1   : > { %v3387_v5 = vpop.f32.mrb[16].mxu1 }
 0x5d2   : > { %v3996_v19 = vpop.f32.mrb[17].mxu1 }
 0x5d3   : > { %v3390_v20 = vpop.f32.mrb[18].mxu1 }
 0x5d4   : > { %v3997_v54 = vpop.f32.mrb[19].mxu1 }
 0x5d9   : > { %v3467_v37 = vpop.f32.mrb[20].mxu1 }
 0x5da   : > { %v3468_v45 = vadd.f32 %v3467_v37, %v3387_v5  ;;  %v4002_v14 = vpop.f32.mrb[21].mxu1 }
 0x5db   : > { %v3470_v60 = vpop.f32.mrb[22].mxu1 }
 0x5dc   : > { %v4003_v39 = vpop.f32.mrb[23].mxu1 }
 0x5e1   : > { %v3558_v41 = vpop.f32.mrb[24].mxu1 }
 0x5e2   : > { %v3564_v40 = vadd.f32 %v3558_v41, %v3468_v45  ;;  %v4008_v1 = vpop.f32.mrb[25].mxu1 }
 0x5e3   : > { %v3561_v21 = vpop.f32.mrb[26].mxu1 }
 0x5e4   : > { %v4009_v47 = vpop.f32.mrb[27].mxu1 }
 0x5e9   : > { %v3650_v11 = vpop.f32.mrb[28].mxu1 }
 0x5ea   : > { %v3656_v50 = vadd.f32 %v3650_v11, %v3564_v40  ;;  %v4014_v24 = vpop.f32.mrb[29].mxu1 }
 0x5eb   : > { %v3653_v63 = vpop.f32.mrb[30].mxu1 }
 0x5ec   : > { %v3664_v29 = vadd.f32 %v3938_v18, %v3656_v50  ;;  %v4015_v59 = vpop.f32.mrb[31].mxu1 }
 0x5ee   : > { %3665 = vst [vmem:[%s289_s9] sm:$0xff] %v3664_v29 }
 0x5ef   : > { %4385 = shalt.err (!%p4382_p7)
}
 0x5f0   : > { %s4386_s15 = scalar_lea.hbm %s5854_s19, 128  ;;  %s4390_s29 = scalar_lea.hbm %s5903_s7, 256 }
 0x5f1   : > { %p4387_p8 = scmp.ne.s32.totalorder %s5854_s19, %s4386_s15  ;;  %p4391_p1 = scmp.lt.u32.totalorder %s5854_s19, %s5903_s7 }
 0x5f2   : > { %p4392_p0 = scmp.lt.u32.totalorder %s4390_s29, %s4386_s15  ;;  %p4394_p6 = scmp.lt.u32.totalorder %s4386_s15, %s5854_s19 }
 0x5f3   : > { %p4388_p11 = pnand %p4387_p8, %p5929_p9 }
 0x5f4   : > { %p4393_p5 = por %p4392_p0, %p4391_p1 }
 0x5f5   : > { %p4389_p13 = pneg %p4388_p11 }
 0x5f6   : > { %p4395_p10 = por %p4394_p6, %p4393_p5 }
 0x5f8   : > { %p4396_p12 = pnand %p4395_p10, %p4389_p13 }
 0x5fa   : > { %4399 = shalt.err (!%p4396_p12)
}
 0x5fb   : > { %4020 = dma.vmem_to_hbm [thread:$0]  (%p5929_p9), %s5856_s14, 128, %s5854_s19, %s3667_s20  }
 0x5fc PF: > { %p4032_p2 = scmp.ge.s32.totalorder %s4438_s27, 2  ;;  %s3692_s17 = sand.u32 1, %s4426_s24  }
 0x5fd   : > { %p5930_p3 = scmp.ne.s32.totalorder %s5910_s12, 0  ;;  %s3693_s18 = scalar_lea.sflag [#allocation4], %s3692_s17 }
 0x5ff   : > { %p4027_p4 = pnand %p4032_p2, %p5930_p3 }
 0x601   : > { %4421 = dma.done.wait (!%p4027_p4), %s3693_s18, 128  }
 0x602   : > { %4423 = vsyncadd (!%p4027_p4), %s3693_s18, 4294967168  ;;  %p18_p7 = scmp.ge.s32.totalorder %s4520_s30, 4   ;;  %s5931_s24 = smov %s4430_s25 }
 0x603   : > { %s5932_s25 = smov %s4434_s26  ;;  %s5933_s26 = smov %s4531_s10 }
 0x604   : > { %s5934_s27 = smov %s4520_s30  ;;  %20 = sbr.rel (!%p18_p7) target bundleno = 4 (0x4), region = 91 }
 0x60b   :  { %3698 = vsyncpa [#allocation3], 1 }
 0x60c   :  { %3700 = vsyncpa [#allocation3 + $0x1], 1 }
 0x60d   :  { %3701 = vsyncpa [#allocation4], 1 }
 0x60e   :  { %3703 = vsyncpa [#allocation4 + $0x1], 1 }

</bundles_post_ra>
